<compile_context>
chip_gen: v7x
topology: tpu7x:2x2x1
jax: 0.10.0
libtpu: 0.0.40
codegen_flags: <defaults>
</compile_context>

<pallas_src>
import jax
import jax.numpy as jnp
import numpy as np
from jax.experimental import pallas as pl
from jax.experimental.pallas import tpu as pltpu

EMB_DIM = 128
NUM_HEADS = 8
INNER_DIM = EMB_DIM // NUM_HEADS            # 16  (qkv projects to 3*INNER_DIM)
HEAD_DIM = INNER_DIM // NUM_HEADS           # 2   (module asserts inner % heads == 0)
SCALE = INNER_DIM ** (-0.5)                 # scale uses inner_dim, per the module
LN_EPS = 1e-5


def _xor_partner(x, lane, k):
    """Value held by each lane's XOR-k partner (k a power of two, groups aligned).

    Implemented as two lane rotations (slice + concat, direction-unambiguous; XLU
    work, not VALU) and one select on a precomputed lane iota.
    """
    n = x.shape[-1]
    up = jnp.concatenate([x[..., k:], x[..., :k]], axis=-1)            # lane L -> x[L + k]
    dn = jnp.concatenate([x[..., n - k:], x[..., :n - k]], axis=-1)    # lane L -> x[L - k]
    return jnp.where((lane & k) == 0, up, dn)


def _seg_allreduce(x, lane, ks, op):
    """Butterfly all-reduce over the lane-index bits in `ks`.

    After the loop every lane holds the reduction over its aligned power-of-two
    lane group (e.g. the 8 key-token slots of one (head, d) column)."""
    for k in ks:
        x = op(x, _xor_partner(x, lane, k))
    return x


def attention_kernel(x_ref, ln_w_ref, ln_b_ref, w_big_ref, wp_ref, bias_ref, o_ref):
    """One batch-block per grid step; everything resident in VMEM.

    Row index r = (batch, query-token).  Lane layout of the attention core:
    lane = j*inner + h*head_dim + d  (j = key token, h = head, d = head-dim slot),
    i.e. 128 dense lanes for N=8 tokens.
    """
    Bblk, N, E = x_ref.shape
    QL, _ = wp_ref.shape                 # N * inner   (attention-core lane width)
    inner = QL // N                      # num_heads * head_dim
    R = Bblk * N                         # rows handled this grid step

    # ---- LayerNorm (f32, biased variance, eps=1e-5, like torch.nn.LayerNorm) ----
    x = x_ref[...].reshape(R, E)                                    # merge major dims (free)
    mean = jnp.mean(x, axis=-1, keepdims=True)
    var = jnp.mean(jnp.square(x - mean), axis=-1, keepdims=True)
    xn = (x - mean) * jax.lax.rsqrt(var + LN_EPS)
    xn = xn * ln_w_ref[...] + ln_b_ref[...]                         # [R, E]

    # ---- single lane-dense QKV matmul (bf16 operands, f32 accumulate) ----
    # columns: [0, QL)          q, pre-scaled and pre-replicated per key token j
    #          [QL, QL+inner)   k
    #          [QL+inner, end)  v
    proj = jnp.dot(xn.astype(w_big_ref.dtype), w_big_ref[...],
                   preferred_element_type=jnp.float32)              # [R, QL + 2*inner]
    q_rep = proj[:, :QL]                                            # lane j*inner+c -> q_scaled[r, c]
    k = proj[:, QL:QL + inner]                                      # [R, inner]
    v = proj[:, QL + inner:QL + 2 * inner]                          # [R, inner]

    # ---- key/value tokens -> lanes (one small relayout per block), broadcast over i ----
    def tokens_to_lanes(a):                                         # [R, inner] -> [Bblk, QL]
        a3 = a.reshape(Bblk, N, inner)
        return jnp.concatenate([a3[:, j, :] for j in range(N)], axis=-1)

    k_b = jnp.broadcast_to(tokens_to_lanes(k)[:, None, :], (Bblk, N, QL)).reshape(R, QL)
    v_b = jnp.broadcast_to(tokens_to_lanes(v)[:, None, :], (Bblk, N, QL)).reshape(R, QL)

    lane = jax.lax.broadcasted_iota(jnp.int32, (R, QL), 1)          # hoisted lane iota
    d_bits = []
    t = 1
    while t < HEAD_DIM:                                             # head-dim lane bits
        d_bits.append(t)
        t *= 2
    j_bits = []
    t = inner
    while t < QL:                                                   # key-token lane bits
        j_bits.append(t)
        t *= 2

    # ---- scores on the VPU (head_dim=2 contraction is not MXU work) ----
    prod = q_rep * k_b                                              # q_scaled[r,(h,d)] * k[b,j,(h,d)]
    s = _seg_allreduce(prod, lane, d_bits, jnp.add)                 # scores (duplicated over d lanes)

    # ---- lane-dense per-head softmax over the key-token bits ----
    m = _seg_allreduce(s, lane, j_bits, jnp.maximum)
    e = jnp.exp(s - m)
    denom = _seg_allreduce(e, lane, j_bits, jnp.add)
    attn = e * pl.reciprocal(denom, approx=True)
    # TODO(synk): attention/projection dropout omitted — module default p=0.0 (identity).

    # ---- attn @ v fused with the output projection ----
    # (attn * v_b)[r, j*inner + (h,d)] = attn[b,h,i,j] * v[b,j,(h,d)]; the sum over j is
    # folded into the projection matmul because Wproj was tiled over j at prep time.
    out = jnp.dot((attn * v_b).astype(wp_ref.dtype), wp_ref[...],
                  preferred_element_type=jnp.float32)               # [R, E]
    out = out + bias_ref[...]
    o_ref[...] = out.reshape(Bblk, N, E).astype(o_ref.dtype)


def prepare_params(ln_w, ln_b, wqkv, wproj, bproj, *, n_tokens, matmul_dtype=jnp.bfloat16):
    """One-time weight preparation (hoisted out of the per-call hot path).

    PyTorch layouts in:  wqkv [3*inner, E], wproj [E, inner].
    Kernel layouts out:
      w_big   [E, n_tokens*inner + 2*inner] = [ tile_j(Wq^T * scale) | Wk^T | Wv^T ]
      wp_tile [n_tokens*inner, E]           = tile_j(Wproj^T)  (folds the sum over key
                                              tokens into the projection contraction)
    """
    E = ln_w.shape[0]
    inner = wqkv.shape[0] // 3
    scale = inner ** (-0.5)
    wq = wqkv[0 * inner:1 * inner].T * scale            # [E, inner]
    wk = wqkv[1 * inner:2 * inner].T                    # [E, inner]
    wv = wqkv[2 * inner:3 * inner].T                    # [E, inner]
    w_big = jnp.concatenate([jnp.tile(wq, (1, n_tokens)), wk, wv], axis=1)
    wp_tile = jnp.tile(wproj.T, (n_tokens, 1))          # [n_tokens*inner, E]
    return (ln_w.reshape(1, E).astype(jnp.float32),
            ln_b.reshape(1, E).astype(jnp.float32),
            w_big.astype(matmul_dtype),
            wp_tile.astype(matmul_dtype),
            bproj.reshape(1, E).astype(jnp.float32))


def _num_tensorcores():
    """2 on v7x (two TensorCores per chip), else 1 (v5e/v6e)."""
    try:
        kind = jax.devices()[0].device_kind.lower()
    except Exception:
        return 1
    return 2 if "v7" in kind else 1


def _pick_b_block(batch, n_tokens, *, num_cores=1, max_rows=1024):
    """Largest batch block (divisor of `batch`) whose rows fit the VMEM budget.

    Single grid step when possible (no pipeline overhead on the 1-TC v5e/v6e);
    on multi-core chips prefer a step count divisible by num_cores so
    CORE_PARALLEL can split the grid evenly across TensorCores."""
    divisors = [d for d in range(1, batch + 1) if batch % d == 0]
    fits = [d for d in divisors if d * n_tokens <= max_rows] or [1]
    if num_cores > 1:
        even = [d for d in fits if (batch // d) % num_cores == 0]
        if even:
            return max(even)
    return max(fits)


def attention_forward(x, params, *, b_block=None, core_parallel=None):
    """x: [B, N, E]; params from prepare_params(..., n_tokens=N)."""
    B, N, E = x.shape
    ln_w, ln_b, w_big, wp_tile, bias = params
    QL = wp_tile.shape[0]
    inner = QL // N
    assert E == EMB_DIM and (N & (N - 1)) == 0, "kernel assumes E=128 and power-of-two N"
    assert w_big.shape == (E, QL + 2 * inner)

    num_cores = _num_tensorcores() if core_parallel is None else (2 if core_parallel else 1)
    if b_block is None:
        b_block = _pick_b_block(B, N, num_cores=num_cores)
    assert B % b_block == 0
    steps = B // b_block
    use_core_parallel = num_cores > 1 and steps >= num_cores and steps % num_cores == 0
    semantics = (pltpu.CORE_PARALLEL,) if use_core_parallel else ("parallel",)

    return pl.pallas_call(
        attention_kernel,
        out_shape=jax.ShapeDtypeStruct((B, N, E), x.dtype),
        grid_spec=pltpu.PrefetchScalarGridSpec(
            num_scalar_prefetch=0,
            grid=(steps,),
            in_specs=[
                pl.BlockSpec((b_block, N, E), lambda b: (b, 0, 0)),     # x block
                pl.BlockSpec((1, E), lambda b: (0, 0)),                 # LN gamma
                pl.BlockSpec((1, E), lambda b: (0, 0)),                 # LN beta
                pl.BlockSpec((E, QL + 2 * inner), lambda b: (0, 0)),    # packed QKV weight (bf16)
                pl.BlockSpec((QL, E), lambda b: (0, 0)),                # tiled projection weight (bf16)
                pl.BlockSpec((1, E), lambda b: (0, 0)),                 # projection bias
            ],
            out_specs=pl.BlockSpec((b_block, N, E), lambda b: (b, 0, 0)),
        ),
        compiler_params=pltpu.CompilerParams(dimension_semantics=semantics),
    )(x, ln_w, ln_b, w_big, wp_tile, bias)


def reference(x, ln_w, ln_b, wqkv, wproj, bproj):
    """Plain-JAX mirror of the PyTorch forward, for verification."""
    B, N, E = x.shape
    mean = x.mean(-1, keepdims=True)
    var = ((x - mean) ** 2).mean(-1, keepdims=True)
    xn = (x - mean) / jnp.sqrt(var + LN_EPS) * ln_w + ln_b
    qkv = xn @ wqkv.T
    q, k, v = jnp.split(qkv, 3, axis=-1)

    def to_heads(a):
        return a.reshape(B, N, NUM_HEADS, HEAD_DIM).transpose(0, 2, 1, 3)

    q, k, v = to_heads(q) * SCALE, to_heads(k), to_heads(v)
    attn = jnp.einsum("bhid,bhjd->bhij", q, k)
    attn = jax.nn.softmax(attn, axis=-1)
    o = jnp.einsum("bhij,bhjd->bhid", attn, v)
    o = o.transpose(0, 2, 1, 3).reshape(B, N, INNER_DIM)
    return o @ wproj.T + bproj


if __name__ == "__main__":
    key = jax.random.PRNGKey(0)
    kx, kq, kp, kb, kg, kbt = jax.random.split(key, 6)
    B, N = 2, 8

    x = jax.random.normal(kx, (B, N, EMB_DIM), dtype=jnp.float32)
    # Deterministic synthetic parameters (shapes follow the module __init__).
    ln_w = 1.0 + 0.1 * jax.random.normal(kg, (EMB_DIM,), jnp.float32)     # LayerNorm gamma
    ln_b = 0.05 * jax.random.normal(kbt, (EMB_DIM,), jnp.float32)         # LayerNorm beta
    wqkv = jax.random.normal(kq, (3 * INNER_DIM, EMB_DIM), jnp.float32) * (EMB_DIM ** -0.5)
    wproj = jax.random.normal(kp, (EMB_DIM, INNER_DIM), jnp.float32) * (INNER_DIM ** -0.5)
    bproj = jax.random.normal(kb, (EMB_DIM,), jnp.float32) * 0.01

    params = prepare_params(ln_w, ln_b, wqkv, wproj, bproj, n_tokens=N)   # one-time weight prep
    try:
        out = attention_forward(x, params)             # auto: CORE_PARALLEL on 2-TC chips
    except Exception:
        out = attention_forward(x, params, core_parallel=False)   # safe single-core fallback
    out = jax.block_until_ready(out)

    ref = reference(x, ln_w, ln_b, wqkv, wproj, bproj)
    # bf16 matmul operands + approx reciprocal => slightly looser than exact f32 parity.
    np.testing.assert_allclose(np.asarray(out), np.asarray(ref), atol=2.5e-2, rtol=2.5e-2)
    print("KERNEL_OK")
</pallas_src>

<mosaic_0001>
module attributes {stable_mosaic.version = 11 : i64} {
  func.func @attention_kernel(%arg0: i32, %arg1: memref<2x8x128xf32, #tpu.memory_space<vmem>>, %arg2: memref<1x128xf32, #tpu.memory_space<vmem>>, %arg3: memref<1x128xf32, #tpu.memory_space<vmem>>, %arg4: memref<128x160xbf16, #tpu.memory_space<vmem>>, %arg5: memref<128x128xbf16, #tpu.memory_space<vmem>>, %arg6: memref<1x128xf32, #tpu.memory_space<vmem>>, %arg7: memref<2x8x128xf32, #tpu.memory_space<vmem>>) attributes {dimension_semantics = [#tpu.dimension_semantics<parallel>], iteration_bounds = array<i64: 1>, scalar_prefetch = 0 : i64, scratch_operands = 0 : i64, tpu.core_type = #tpu.core_type<tc>, window_params = [{transform_indices = @transform_0, window_bounds = array<i64: 2, 8, 128>}, {pipeline_mode = #tpu.pipeline_mode<synchronous>, transform_indices = @transform_1, window_bounds = array<i64: 1, 128>}, {pipeline_mode = #tpu.pipeline_mode<synchronous>, transform_indices = @transform_2, window_bounds = array<i64: 1, 128>}, {pipeline_mode = #tpu.pipeline_mode<synchronous>, transform_indices = @transform_3, window_bounds = array<i64: 128, 160>}, {pipeline_mode = #tpu.pipeline_mode<synchronous>, transform_indices = @transform_4, window_bounds = array<i64: 128, 128>}, {pipeline_mode = #tpu.pipeline_mode<synchronous>, transform_indices = @transform_5, window_bounds = array<i64: 1, 128>}, {transform_indices = @transform_6, window_bounds = array<i64: 2, 8, 128>}]} {
    %c0 = arith.constant 0 : index
    %c0_0 = arith.constant 0 : index
    %c0_1 = arith.constant 0 : index
    %0 = vector.load %arg1[%c0, %c0_0, %c0_1] : memref<2x8x128xf32, #tpu.memory_space<vmem>>, vector<2x8x128xf32>
    %1 = vector.shape_cast %0 : vector<2x8x128xf32> to vector<16x128xf32>
    %cst = arith.constant dense<0.000000e+00> : vector<16xf32>
    %2 = vector.multi_reduction <add>, %1, %cst [1] : vector<16x128xf32> to vector<16xf32>
    %3 = vector.shape_cast %2 : vector<16xf32> to vector<16x1xf32>
    %cst_2 = arith.constant 1.280000e+02 : f32
    %4 = vector.broadcast %cst_2 : f32 to vector<16x1xf32>
    %5 = arith.divf %3, %4 : vector<16x1xf32>
    %6 = vector.broadcast %5 : vector<16x1xf32> to vector<16x128xf32>
    %7 = arith.subf %1, %6 : vector<16x128xf32>
    %8 = arith.mulf %7, %7 : vector<16x128xf32>
    %cst_3 = arith.constant dense<0.000000e+00> : vector<16xf32>
    %9 = vector.multi_reduction <add>, %8, %cst_3 [1] : vector<16x128xf32> to vector<16xf32>
    %10 = vector.shape_cast %9 : vector<16xf32> to vector<16x1xf32>
    %cst_4 = arith.constant 1.280000e+02 : f32
    %11 = vector.broadcast %cst_4 : f32 to vector<16x1xf32>
    %12 = arith.divf %10, %11 : vector<16x1xf32>
    %13 = vector.broadcast %5 : vector<16x1xf32> to vector<16x128xf32>
    %14 = arith.subf %1, %13 : vector<16x128xf32>
    %cst_5 = arith.constant 9.99999974E-6 : f32
    %15 = vector.broadcast %cst_5 : f32 to vector<16x1xf32>
    %16 = arith.addf %12, %15 : vector<16x1xf32>
    %17 = math.rsqrt %16 : vector<16x1xf32>
    %18 = vector.broadcast %17 : vector<16x1xf32> to vector<16x128xf32>
    %19 = arith.mulf %14, %18 : vector<16x128xf32>
    %c0_6 = arith.constant 0 : index
    %c0_7 = arith.constant 0 : index
    %20 = vector.load %arg2[%c0_6, %c0_7] : memref<1x128xf32, #tpu.memory_space<vmem>>, vector<1x128xf32>
    %21 = vector.broadcast %20 : vector<1x128xf32> to vector<16x128xf32>
    %22 = arith.mulf %19, %21 : vector<16x128xf32>
    %c0_8 = arith.constant 0 : index
    %c0_9 = arith.constant 0 : index
    %23 = vector.load %arg3[%c0_8, %c0_9] : memref<1x128xf32, #tpu.memory_space<vmem>>, vector<1x128xf32>
    %24 = vector.broadcast %23 : vector<1x128xf32> to vector<16x128xf32>
    %25 = arith.addf %22, %24 : vector<16x128xf32>
    %26 = arith.truncf %25 : vector<16x128xf32> to vector<16x128xbf16>
    %c0_10 = arith.constant 0 : index
    %c0_11 = arith.constant 0 : index
    %27 = vector.load %arg4[%c0_10, %c0_11] : memref<128x160xbf16, #tpu.memory_space<vmem>>, vector<128x160xbf16>
    %cst_12 = arith.constant dense<0.000000e+00> : vector<16x160xf32>
    %28 = tpu.matmul %26, %27, %cst_12 {dimension_numbers = #tpu.dot_dimension_numbers<[1], [0], [0], [1], [0, 0, 1, 1], [], []>} : vector<16x128xbf16>, vector<128x160xbf16>, vector<16x160xf32> -> vector<16x160xf32>
    %29 = vector.extract_strided_slice %28 {offsets = [0, 0], sizes = [16, 128], strides = [1, 1]} : vector<16x160xf32> to vector<16x128xf32>
    %30 = vector.extract_strided_slice %28 {offsets = [0, 128], sizes = [16, 16], strides = [1, 1]} : vector<16x160xf32> to vector<16x16xf32>
    %31 = vector.extract_strided_slice %28 {offsets = [0, 144], sizes = [16, 16], strides = [1, 1]} : vector<16x160xf32> to vector<16x16xf32>
    %32 = vector.shape_cast %30 : vector<16x16xf32> to vector<2x8x16xf32>
    %33 = vector.extract_strided_slice %32 {offsets = [0, 0, 0], sizes = [2, 1, 16], strides = [1, 1, 1]} : vector<2x8x16xf32> to vector<2x1x16xf32>
    %34 = vector.shape_cast %33 : vector<2x1x16xf32> to vector<2x16xf32>
    %35 = vector.extract_strided_slice %32 {offsets = [0, 1, 0], sizes = [2, 1, 16], strides = [1, 1, 1]} : vector<2x8x16xf32> to vector<2x1x16xf32>
    %36 = vector.shape_cast %35 : vector<2x1x16xf32> to vector<2x16xf32>
    %37 = vector.extract_strided_slice %32 {offsets = [0, 2, 0], sizes = [2, 1, 16], strides = [1, 1, 1]} : vector<2x8x16xf32> to vector<2x1x16xf32>
    %38 = vector.shape_cast %37 : vector<2x1x16xf32> to vector<2x16xf32>
    %39 = vector.extract_strided_slice %32 {offsets = [0, 3, 0], sizes = [2, 1, 16], strides = [1, 1, 1]} : vector<2x8x16xf32> to vector<2x1x16xf32>
    %40 = vector.shape_cast %39 : vector<2x1x16xf32> to vector<2x16xf32>
    %41 = vector.extract_strided_slice %32 {offsets = [0, 4, 0], sizes = [2, 1, 16], strides = [1, 1, 1]} : vector<2x8x16xf32> to vector<2x1x16xf32>
    %42 = vector.shape_cast %41 : vector<2x1x16xf32> to vector<2x16xf32>
    %43 = vector.extract_strided_slice %32 {offsets = [0, 5, 0], sizes = [2, 1, 16], strides = [1, 1, 1]} : vector<2x8x16xf32> to vector<2x1x16xf32>
    %44 = vector.shape_cast %43 : vector<2x1x16xf32> to vector<2x16xf32>
    %45 = vector.extract_strided_slice %32 {offsets = [0, 6, 0], sizes = [2, 1, 16], strides = [1, 1, 1]} : vector<2x8x16xf32> to vector<2x1x16xf32>
    %46 = vector.shape_cast %45 : vector<2x1x16xf32> to vector<2x16xf32>
    %47 = vector.extract_strided_slice %32 {offsets = [0, 7, 0], sizes = [2, 1, 16], strides = [1, 1, 1]} : vector<2x8x16xf32> to vector<2x1x16xf32>
    %48 = vector.shape_cast %47 : vector<2x1x16xf32> to vector<2x16xf32>
    %49 = tpu.concatenate %34, %36, %38, %40, %42, %44, %46, %48 in 1 : vector<2x16xf32>, vector<2x16xf32>, vector<2x16xf32>, vector<2x16xf32>, vector<2x16xf32>, vector<2x16xf32>, vector<2x16xf32>, vector<2x16xf32> -> vector<2x128xf32>
    %50 = vector.shape_cast %49 : vector<2x128xf32> to vector<2x1x128xf32>
    %51 = vector.shape_cast %50 : vector<2x1x128xf32> to vector<2x1x128xf32>
    %52 = vector.broadcast %51 : vector<2x1x128xf32> to vector<2x8x128xf32>
    %53 = vector.shape_cast %52 : vector<2x8x128xf32> to vector<16x128xf32>
    %54 = vector.shape_cast %31 : vector<16x16xf32> to vector<2x8x16xf32>
    %55 = vector.extract_strided_slice %54 {offsets = [0, 0, 0], sizes = [2, 1, 16], strides = [1, 1, 1]} : vector<2x8x16xf32> to vector<2x1x16xf32>
    %56 = vector.shape_cast %55 : vector<2x1x16xf32> to vector<2x16xf32>
    %57 = vector.extract_strided_slice %54 {offsets = [0, 1, 0], sizes = [2, 1, 16], strides = [1, 1, 1]} : vector<2x8x16xf32> to vector<2x1x16xf32>
    %58 = vector.shape_cast %57 : vector<2x1x16xf32> to vector<2x16xf32>
    %59 = vector.extract_strided_slice %54 {offsets = [0, 2, 0], sizes = [2, 1, 16], strides = [1, 1, 1]} : vector<2x8x16xf32> to vector<2x1x16xf32>
    %60 = vector.shape_cast %59 : vector<2x1x16xf32> to vector<2x16xf32>
    %61 = vector.extract_strided_slice %54 {offsets = [0, 3, 0], sizes = [2, 1, 16], strides = [1, 1, 1]} : vector<2x8x16xf32> to vector<2x1x16xf32>
    %62 = vector.shape_cast %61 : vector<2x1x16xf32> to vector<2x16xf32>
    %63 = vector.extract_strided_slice %54 {offsets = [0, 4, 0], sizes = [2, 1, 16], strides = [1, 1, 1]} : vector<2x8x16xf32> to vector<2x1x16xf32>
    %64 = vector.shape_cast %63 : vector<2x1x16xf32> to vector<2x16xf32>
    %65 = vector.extract_strided_slice %54 {offsets = [0, 5, 0], sizes = [2, 1, 16], strides = [1, 1, 1]} : vector<2x8x16xf32> to vector<2x1x16xf32>
    %66 = vector.shape_cast %65 : vector<2x1x16xf32> to vector<2x16xf32>
    %67 = vector.extract_strided_slice %54 {offsets = [0, 6, 0], sizes = [2, 1, 16], strides = [1, 1, 1]} : vector<2x8x16xf32> to vector<2x1x16xf32>
    %68 = vector.shape_cast %67 : vector<2x1x16xf32> to vector<2x16xf32>
    %69 = vector.extract_strided_slice %54 {offsets = [0, 7, 0], sizes = [2, 1, 16], strides = [1, 1, 1]} : vector<2x8x16xf32> to vector<2x1x16xf32>
    %70 = vector.shape_cast %69 : vector<2x1x16xf32> to vector<2x16xf32>
    %71 = tpu.concatenate %56, %58, %60, %62, %64, %66, %68, %70 in 1 : vector<2x16xf32>, vector<2x16xf32>, vector<2x16xf32>, vector<2x16xf32>, vector<2x16xf32>, vector<2x16xf32>, vector<2x16xf32>, vector<2x16xf32> -> vector<2x128xf32>
    %72 = vector.shape_cast %71 : vector<2x128xf32> to vector<2x1x128xf32>
    %73 = vector.shape_cast %72 : vector<2x1x128xf32> to vector<2x1x128xf32>
    %74 = vector.broadcast %73 : vector<2x1x128xf32> to vector<2x8x128xf32>
    %75 = vector.shape_cast %74 : vector<2x8x128xf32> to vector<16x128xf32>
    %76 = tpu.iota {dimensions = array<i32: 1>} : vector<16x128xi32>
    %77 = arith.mulf %29, %53 : vector<16x128xf32>
    %78 = vector.extract_strided_slice %77 {offsets = [0, 1], sizes = [16, 127], strides = [1, 1]} : vector<16x128xf32> to vector<16x127xf32>
    %79 = vector.extract_strided_slice %77 {offsets = [0, 0], sizes = [16, 1], strides = [1, 1]} : vector<16x128xf32> to vector<16x1xf32>
    %80 = tpu.concatenate %78, %79 in 1 : vector<16x127xf32>, vector<16x1xf32> -> vector<16x128xf32>
    %81 = vector.extract_strided_slice %77 {offsets = [0, 127], sizes = [16, 1], strides = [1, 1]} : vector<16x128xf32> to vector<16x1xf32>
    %82 = vector.extract_strided_slice %77 {offsets = [0, 0], sizes = [16, 127], strides = [1, 1]} : vector<16x128xf32> to vector<16x127xf32>
    %83 = tpu.concatenate %81, %82 in 1 : vector<16x1xf32>, vector<16x127xf32> -> vector<16x128xf32>
    %c1_i32 = arith.constant 1 : i32
    %84 = vector.broadcast %c1_i32 : i32 to vector<16x128xi32>
    %85 = arith.andi %76, %84 : vector<16x128xi32>
    %c0_i32 = arith.constant 0 : i32
    %86 = vector.broadcast %c0_i32 : i32 to vector<16x128xi32>
    %87 = arith.cmpi eq, %85, %86 : vector<16x128xi32>
    %88 = arith.select %87, %80, %83 : vector<16x128xi1>, vector<16x128xf32>
    %89 = arith.addf %77, %88 : vector<16x128xf32>
    %90 = vector.extract_strided_slice %89 {offsets = [0, 16], sizes = [16, 112], strides = [1, 1]} : vector<16x128xf32> to vector<16x112xf32>
    %91 = vector.extract_strided_slice %89 {offsets = [0, 0], sizes = [16, 16], strides = [1, 1]} : vector<16x128xf32> to vector<16x16xf32>
    %92 = tpu.concatenate %90, %91 in 1 : vector<16x112xf32>, vector<16x16xf32> -> vector<16x128xf32>
    %93 = vector.extract_strided_slice %89 {offsets = [0, 112], sizes = [16, 16], strides = [1, 1]} : vector<16x128xf32> to vector<16x16xf32>
    %94 = vector.extract_strided_slice %89 {offsets = [0, 0], sizes = [16, 112], strides = [1, 1]} : vector<16x128xf32> to vector<16x112xf32>
    %95 = tpu.concatenate %93, %94 in 1 : vector<16x16xf32>, vector<16x112xf32> -> vector<16x128xf32>
    %c16_i32 = arith.constant 16 : i32
    %96 = vector.broadcast %c16_i32 : i32 to vector<16x128xi32>
    %97 = arith.andi %76, %96 : vector<16x128xi32>
    %c0_i32_13 = arith.constant 0 : i32
    %98 = vector.broadcast %c0_i32_13 : i32 to vector<16x128xi32>
    %99 = arith.cmpi eq, %97, %98 : vector<16x128xi32>
    %100 = arith.select %99, %92, %95 : vector<16x128xi1>, vector<16x128xf32>
    %101 = arith.maximumf %89, %100 : vector<16x128xf32>
    %102 = vector.extract_strided_slice %101 {offsets = [0, 32], sizes = [16, 96], strides = [1, 1]} : vector<16x128xf32> to vector<16x96xf32>
    %103 = vector.extract_strided_slice %101 {offsets = [0, 0], sizes = [16, 32], strides = [1, 1]} : vector<16x128xf32> to vector<16x32xf32>
    %104 = tpu.concatenate %102, %103 in 1 : vector<16x96xf32>, vector<16x32xf32> -> vector<16x128xf32>
    %105 = vector.extract_strided_slice %101 {offsets = [0, 96], sizes = [16, 32], strides = [1, 1]} : vector<16x128xf32> to vector<16x32xf32>
    %106 = vector.extract_strided_slice %101 {offsets = [0, 0], sizes = [16, 96], strides = [1, 1]} : vector<16x128xf32> to vector<16x96xf32>
    %107 = tpu.concatenate %105, %106 in 1 : vector<16x32xf32>, vector<16x96xf32> -> vector<16x128xf32>
    %c32_i32 = arith.constant 32 : i32
    %108 = vector.broadcast %c32_i32 : i32 to vector<16x128xi32>
    %109 = arith.andi %76, %108 : vector<16x128xi32>
    %c0_i32_14 = arith.constant 0 : i32
    %110 = vector.broadcast %c0_i32_14 : i32 to vector<16x128xi32>
    %111 = arith.cmpi eq, %109, %110 : vector<16x128xi32>
    %112 = arith.select %111, %104, %107 : vector<16x128xi1>, vector<16x128xf32>
    %113 = arith.maximumf %101, %112 : vector<16x128xf32>
    %114 = vector.extract_strided_slice %113 {offsets = [0, 64], sizes = [16, 64], strides = [1, 1]} : vector<16x128xf32> to vector<16x64xf32>
    %115 = vector.extract_strided_slice %113 {offsets = [0, 0], sizes = [16, 64], strides = [1, 1]} : vector<16x128xf32> to vector<16x64xf32>
    %116 = tpu.concatenate %114, %115 in 1 : vector<16x64xf32>, vector<16x64xf32> -> vector<16x128xf32>
    %117 = vector.extract_strided_slice %113 {offsets = [0, 64], sizes = [16, 64], strides = [1, 1]} : vector<16x128xf32> to vector<16x64xf32>
    %118 = vector.extract_strided_slice %113 {offsets = [0, 0], sizes = [16, 64], strides = [1, 1]} : vector<16x128xf32> to vector<16x64xf32>
    %119 = tpu.concatenate %117, %118 in 1 : vector<16x64xf32>, vector<16x64xf32> -> vector<16x128xf32>
    %c64_i32 = arith.constant 64 : i32
    %120 = vector.broadcast %c64_i32 : i32 to vector<16x128xi32>
    %121 = arith.andi %76, %120 : vector<16x128xi32>
    %c0_i32_15 = arith.constant 0 : i32
    %122 = vector.broadcast %c0_i32_15 : i32 to vector<16x128xi32>
    %123 = arith.cmpi eq, %121, %122 : vector<16x128xi32>
    %124 = arith.select %123, %116, %119 : vector<16x128xi1>, vector<16x128xf32>
    %125 = arith.maximumf %113, %124 : vector<16x128xf32>
    %126 = arith.subf %89, %125 : vector<16x128xf32>
    %127 = math.exp %126 : vector<16x128xf32>
    %128 = vector.extract_strided_slice %127 {offsets = [0, 16], sizes = [16, 112], strides = [1, 1]} : vector<16x128xf32> to vector<16x112xf32>
    %129 = vector.extract_strided_slice %127 {offsets = [0, 0], sizes = [16, 16], strides = [1, 1]} : vector<16x128xf32> to vector<16x16xf32>
    %130 = tpu.concatenate %128, %129 in 1 : vector<16x112xf32>, vector<16x16xf32> -> vector<16x128xf32>
    %131 = vector.extract_strided_slice %127 {offsets = [0, 112], sizes = [16, 16], strides = [1, 1]} : vector<16x128xf32> to vector<16x16xf32>
    %132 = vector.extract_strided_slice %127 {offsets = [0, 0], sizes = [16, 112], strides = [1, 1]} : vector<16x128xf32> to vector<16x112xf32>
    %133 = tpu.concatenate %131, %132 in 1 : vector<16x16xf32>, vector<16x112xf32> -> vector<16x128xf32>
    %c16_i32_16 = arith.constant 16 : i32
    %134 = vector.broadcast %c16_i32_16 : i32 to vector<16x128xi32>
    %135 = arith.andi %76, %134 : vector<16x128xi32>
    %c0_i32_17 = arith.constant 0 : i32
    %136 = vector.broadcast %c0_i32_17 : i32 to vector<16x128xi32>
    %137 = arith.cmpi eq, %135, %136 : vector<16x128xi32>
    %138 = arith.select %137, %130, %133 : vector<16x128xi1>, vector<16x128xf32>
    %139 = arith.addf %127, %138 : vector<16x128xf32>
    %140 = vector.extract_strided_slice %139 {offsets = [0, 32], sizes = [16, 96], strides = [1, 1]} : vector<16x128xf32> to vector<16x96xf32>
    %141 = vector.extract_strided_slice %139 {offsets = [0, 0], sizes = [16, 32], strides = [1, 1]} : vector<16x128xf32> to vector<16x32xf32>
    %142 = tpu.concatenate %140, %141 in 1 : vector<16x96xf32>, vector<16x32xf32> -> vector<16x128xf32>
    %143 = vector.extract_strided_slice %139 {offsets = [0, 96], sizes = [16, 32], strides = [1, 1]} : vector<16x128xf32> to vector<16x32xf32>
    %144 = vector.extract_strided_slice %139 {offsets = [0, 0], sizes = [16, 96], strides = [1, 1]} : vector<16x128xf32> to vector<16x96xf32>
    %145 = tpu.concatenate %143, %144 in 1 : vector<16x32xf32>, vector<16x96xf32> -> vector<16x128xf32>
    %c32_i32_18 = arith.constant 32 : i32
    %146 = vector.broadcast %c32_i32_18 : i32 to vector<16x128xi32>
    %147 = arith.andi %76, %146 : vector<16x128xi32>
    %c0_i32_19 = arith.constant 0 : i32
    %148 = vector.broadcast %c0_i32_19 : i32 to vector<16x128xi32>
    %149 = arith.cmpi eq, %147, %148 : vector<16x128xi32>
    %150 = arith.select %149, %142, %145 : vector<16x128xi1>, vector<16x128xf32>
    %151 = arith.addf %139, %150 : vector<16x128xf32>
    %152 = vector.extract_strided_slice %151 {offsets = [0, 64], sizes = [16, 64], strides = [1, 1]} : vector<16x128xf32> to vector<16x64xf32>
    %153 = vector.extract_strided_slice %151 {offsets = [0, 0], sizes = [16, 64], strides = [1, 1]} : vector<16x128xf32> to vector<16x64xf32>
    %154 = tpu.concatenate %152, %153 in 1 : vector<16x64xf32>, vector<16x64xf32> -> vector<16x128xf32>
    %155 = vector.extract_strided_slice %151 {offsets = [0, 64], sizes = [16, 64], strides = [1, 1]} : vector<16x128xf32> to vector<16x64xf32>
    %156 = vector.extract_strided_slice %151 {offsets = [0, 0], sizes = [16, 64], strides = [1, 1]} : vector<16x128xf32> to vector<16x64xf32>
    %157 = tpu.concatenate %155, %156 in 1 : vector<16x64xf32>, vector<16x64xf32> -> vector<16x128xf32>
    %c64_i32_20 = arith.constant 64 : i32
    %158 = vector.broadcast %c64_i32_20 : i32 to vector<16x128xi32>
    %159 = arith.andi %76, %158 : vector<16x128xi32>
    %c0_i32_21 = arith.constant 0 : i32
    %160 = vector.broadcast %c0_i32_21 : i32 to vector<16x128xi32>
    %161 = arith.cmpi eq, %159, %160 : vector<16x128xi32>
    %162 = arith.select %161, %154, %157 : vector<16x128xi1>, vector<16x128xf32>
    %163 = arith.addf %151, %162 : vector<16x128xf32>
    %164 = tpu.reciprocal %163 {approx = true} : vector<16x128xf32> -> vector<16x128xf32>
    %165 = arith.mulf %127, %164 : vector<16x128xf32>
    %166 = arith.mulf %165, %75 : vector<16x128xf32>
    %167 = arith.truncf %166 : vector<16x128xf32> to vector<16x128xbf16>
    %c0_22 = arith.constant 0 : index
    %c0_23 = arith.constant 0 : index
    %168 = vector.load %arg5[%c0_22, %c0_23] : memref<128x128xbf16, #tpu.memory_space<vmem>>, vector<128x128xbf16>
    %cst_24 = arith.constant dense<0.000000e+00> : vector<16x128xf32>
    %169 = tpu.matmul %167, %168, %cst_24 {dimension_numbers = #tpu.dot_dimension_numbers<[1], [0], [0], [1], [0, 0, 1, 1], [], []>} : vector<16x128xbf16>, vector<128x128xbf16>, vector<16x128xf32> -> vector<16x128xf32>
    %c0_25 = arith.constant 0 : index
    %c0_26 = arith.constant 0 : index
    %170 = vector.load %arg6[%c0_25, %c0_26] : memref<1x128xf32, #tpu.memory_space<vmem>>, vector<1x128xf32>
    %171 = vector.broadcast %170 : vector<1x128xf32> to vector<16x128xf32>
    %172 = arith.addf %169, %171 : vector<16x128xf32>
    %173 = vector.shape_cast %172 : vector<16x128xf32> to vector<2x8x128xf32>
    %c0_27 = arith.constant 0 : index
    %c0_28 = arith.constant 0 : index
    %c0_29 = arith.constant 0 : index
    %174 = vector.load %arg7[%c0_27, %c0_28, %c0_29] : memref<2x8x128xf32, #tpu.memory_space<vmem>>, vector<2x8x128xf32>
    tpu.vector_store %arg7[%c0_27, %c0_28, %c0_29], %173 {strides = array<i32>} : memref<2x8x128xf32, #tpu.memory_space<vmem>>, vector<2x8x128xf32>,
    return
  }
  func.func @transform_0(%arg0: i32) -> (i32, i32, i32) {
    %c0_i32 = arith.constant 0 : i32
    %c0_i32_0 = arith.constant 0 : i32
    %c0_i32_1 = arith.constant 0 : i32
    return %arg0, %c0_i32, %c0_i32_0 : i32, i32, i32
  }
  func.func @transform_1(%arg0: i32) -> (i32, i32) {
    %c0_i32 = arith.constant 0 : i32
    %c0_i32_0 = arith.constant 0 : i32
    %c0_i32_1 = arith.constant 0 : i32
    return %c0_i32, %c0_i32_0 : i32, i32
  }
  func.func @transform_2(%arg0: i32) -> (i32, i32) {
    %c0_i32 = arith.constant 0 : i32
    %c0_i32_0 = arith.constant 0 : i32
    %c0_i32_1 = arith.constant 0 : i32
    return %c0_i32, %c0_i32_0 : i32, i32
  }
  func.func @transform_3(%arg0: i32) -> (i32, i32) {
    %c0_i32 = arith.constant 0 : i32
    %c0_i32_0 = arith.constant 0 : i32
    %c0_i32_1 = arith.constant 0 : i32
    return %c0_i32, %c0_i32_0 : i32, i32
  }
  func.func @transform_4(%arg0: i32) -> (i32, i32) {
    %c0_i32 = arith.constant 0 : i32
    %c0_i32_0 = arith.constant 0 : i32
    %c0_i32_1 = arith.constant 0 : i32
    return %c0_i32, %c0_i32_0 : i32, i32
  }
  func.func @transform_5(%arg0: i32) -> (i32, i32) {
    %c0_i32 = arith.constant 0 : i32
    %c0_i32_0 = arith.constant 0 : i32
    %c0_i32_1 = arith.constant 0 : i32
    return %c0_i32, %c0_i32_0 : i32, i32
  }
  func.func @transform_6(%arg0: i32) -> (i32, i32, i32) {
    %c0_i32 = arith.constant 0 : i32
    %c0_i32_0 = arith.constant 0 : i32
    %c0_i32_1 = arith.constant 0 : i32
    return %arg0, %c0_i32, %c0_i32_0 : i32, i32, i32
  }
}

module attributes {stable_mosaic.version = 11 : i64} {
  func.func @attention_kernel(%arg0: i32, %arg1: memref<2x8x128xf32, #tpu.memory_space<vmem>>, %arg2: memref<1x128xf32, #tpu.memory_space<vmem>>, %arg3: memref<1x128xf32, #tpu.memory_space<vmem>>, %arg4: memref<128x160xbf16, #tpu.memory_space<vmem>>, %arg5: memref<128x128xbf16, #tpu.memory_space<vmem>>, %arg6: memref<1x128xf32, #tpu.memory_space<vmem>>, %arg7: memref<2x8x128xf32, #tpu.memory_space<vmem>>) attributes {dimension_semantics = [#tpu.dimension_semantics<parallel>], iteration_bounds = array<i64: 1>, scalar_prefetch = 0 : i64, scratch_operands = 0 : i64, tpu.core_type = #tpu.core_type<tc>, window_params = [{transform_indices = @transform_0, window_bounds = array<i64: 2, 8, 128>}, {pipeline_mode = #tpu.pipeline_mode<synchronous>, transform_indices = @transform_1, window_bounds = array<i64: 1, 128>}, {pipeline_mode = #tpu.pipeline_mode<synchronous>, transform_indices = @transform_2, window_bounds = array<i64: 1, 128>}, {pipeline_mode = #tpu.pipeline_mode<synchronous>, transform_indices = @transform_3, window_bounds = array<i64: 128, 160>}, {pipeline_mode = #tpu.pipeline_mode<synchronous>, transform_indices = @transform_4, window_bounds = array<i64: 128, 128>}, {pipeline_mode = #tpu.pipeline_mode<synchronous>, transform_indices = @transform_5, window_bounds = array<i64: 1, 128>}, {transform_indices = @transform_6, window_bounds = array<i64: 2, 8, 128>}]} {
    %c0 = arith.constant 0 : index
    %c0_0 = arith.constant 0 : index
    %c0_1 = arith.constant 0 : index
    %0 = vector.load %arg1[%c0, %c0_0, %c0_1] : memref<2x8x128xf32, #tpu.memory_space<vmem>>, vector<2x8x128xf32>
    %1 = vector.shape_cast %0 : vector<2x8x128xf32> to vector<16x128xf32>
    %cst = arith.constant dense<0.000000e+00> : vector<16xf32>
    %2 = vector.multi_reduction <add>, %1, %cst [1] : vector<16x128xf32> to vector<16xf32>
    %3 = vector.shape_cast %2 : vector<16xf32> to vector<16x1xf32>
    %cst_2 = arith.constant 1.280000e+02 : f32
    %4 = vector.broadcast %cst_2 : f32 to vector<16x1xf32>
    %5 = arith.divf %3, %4 : vector<16x1xf32>
    %6 = vector.broadcast %5 : vector<16x1xf32> to vector<16x128xf32>
    %7 = arith.subf %1, %6 : vector<16x128xf32>
    %8 = arith.mulf %7, %7 : vector<16x128xf32>
    %cst_3 = arith.constant dense<0.000000e+00> : vector<16xf32>
    %9 = vector.multi_reduction <add>, %8, %cst_3 [1] : vector<16x128xf32> to vector<16xf32>
    %10 = vector.shape_cast %9 : vector<16xf32> to vector<16x1xf32>
    %cst_4 = arith.constant 1.280000e+02 : f32
    %11 = vector.broadcast %cst_4 : f32 to vector<16x1xf32>
    %12 = arith.divf %10, %11 : vector<16x1xf32>
    %13 = vector.broadcast %5 : vector<16x1xf32> to vector<16x128xf32>
    %14 = arith.subf %1, %13 : vector<16x128xf32>
    %cst_5 = arith.constant 9.99999974E-6 : f32
    %15 = vector.broadcast %cst_5 : f32 to vector<16x1xf32>
    %16 = arith.addf %12, %15 : vector<16x1xf32>
    %17 = math.rsqrt %16 : vector<16x1xf32>
    %18 = vector.broadcast %17 : vector<16x1xf32> to vector<16x128xf32>
    %19 = arith.mulf %14, %18 : vector<16x128xf32>
    %c0_6 = arith.constant 0 : index
    %c0_7 = arith.constant 0 : index
    %20 = vector.load %arg2[%c0_6, %c0_7] : memref<1x128xf32, #tpu.memory_space<vmem>>, vector<1x128xf32>
    %21 = vector.broadcast %20 : vector<1x128xf32> to vector<16x128xf32>
    %22 = arith.mulf %19, %21 : vector<16x128xf32>
    %c0_8 = arith.constant 0 : index
    %c0_9 = arith.constant 0 : index
    %23 = vector.load %arg3[%c0_8, %c0_9] : memref<1x128xf32, #tpu.memory_space<vmem>>, vector<1x128xf32>
    %24 = vector.broadcast %23 : vector<1x128xf32> to vector<16x128xf32>
    %25 = arith.addf %22, %24 : vector<16x128xf32>
    %26 = arith.truncf %25 : vector<16x128xf32> to vector<16x128xbf16>
    %c0_10 = arith.constant 0 : index
    %c0_11 = arith.constant 0 : index
    %27 = vector.load %arg4[%c0_10, %c0_11] : memref<128x160xbf16, #tpu.memory_space<vmem>>, vector<128x160xbf16>
    %cst_12 = arith.constant dense<0.000000e+00> : vector<16x160xf32>
    %28 = tpu.matmul %26, %27, %cst_12 {dimension_numbers = #tpu.dot_dimension_numbers<[1], [0], [0], [1], [0, 0, 1, 1], [], []>} : vector<16x128xbf16>, vector<128x160xbf16>, vector<16x160xf32> -> vector<16x160xf32>
    %29 = vector.extract_strided_slice %28 {offsets = [0, 0], sizes = [16, 128], strides = [1, 1]} : vector<16x160xf32> to vector<16x128xf32>
    %30 = vector.extract_strided_slice %28 {offsets = [0, 128], sizes = [16, 16], strides = [1, 1]} : vector<16x160xf32> to vector<16x16xf32>
    %31 = vector.extract_strided_slice %28 {offsets = [0, 144], sizes = [16, 16], strides = [1, 1]} : vector<16x160xf32> to vector<16x16xf32>
    %32 = vector.shape_cast %30 : vector<16x16xf32> to vector<2x8x16xf32>
    %33 = vector.extract_strided_slice %32 {offsets = [0, 0, 0], sizes = [2, 1, 16], strides = [1, 1, 1]} : vector<2x8x16xf32> to vector<2x1x16xf32>
    %34 = vector.shape_cast %33 : vector<2x1x16xf32> to vector<2x16xf32>
    %35 = vector.extract_strided_slice %32 {offsets = [0, 1, 0], sizes = [2, 1, 16], strides = [1, 1, 1]} : vector<2x8x16xf32> to vector<2x1x16xf32>
    %36 = vector.shape_cast %35 : vector<2x1x16xf32> to vector<2x16xf32>
    %37 = vector.extract_strided_slice %32 {offsets = [0, 2, 0], sizes = [2, 1, 16], strides = [1, 1, 1]} : vector<2x8x16xf32> to vector<2x1x16xf32>
    %38 = vector.shape_cast %37 : vector<2x1x16xf32> to vector<2x16xf32>
    %39 = vector.extract_strided_slice %32 {offsets = [0, 3, 0], sizes = [2, 1, 16], strides = [1, 1, 1]} : vector<2x8x16xf32> to vector<2x1x16xf32>
    %40 = vector.shape_cast %39 : vector<2x1x16xf32> to vector<2x16xf32>
    %41 = vector.extract_strided_slice %32 {offsets = [0, 4, 0], sizes = [2, 1, 16], strides = [1, 1, 1]} : vector<2x8x16xf32> to vector<2x1x16xf32>
    %42 = vector.shape_cast %41 : vector<2x1x16xf32> to vector<2x16xf32>
    %43 = vector.extract_strided_slice %32 {offsets = [0, 5, 0], sizes = [2, 1, 16], strides = [1, 1, 1]} : vector<2x8x16xf32> to vector<2x1x16xf32>
    %44 = vector.shape_cast %43 : vector<2x1x16xf32> to vector<2x16xf32>
    %45 = vector.extract_strided_slice %32 {offsets = [0, 6, 0], sizes = [2, 1, 16], strides = [1, 1, 1]} : vector<2x8x16xf32> to vector<2x1x16xf32>
    %46 = vector.shape_cast %45 : vector<2x1x16xf32> to vector<2x16xf32>
    %47 = vector.extract_strided_slice %32 {offsets = [0, 7, 0], sizes = [2, 1, 16], strides = [1, 1, 1]} : vector<2x8x16xf32> to vector<2x1x16xf32>
    %48 = vector.shape_cast %47 : vector<2x1x16xf32> to vector<2x16xf32>
    %49 = tpu.concatenate %34, %36, %38, %40, %42, %44, %46, %48 in 1 : vector<2x16xf32>, vector<2x16xf32>, vector<2x16xf32>, vector<2x16xf32>, vector<2x16xf32>, vector<2x16xf32>, vector<2x16xf32>, vector<2x16xf32> -> vector<2x128xf32>
    %50 = vector.shape_cast %49 : vector<2x128xf32> to vector<2x1x128xf32>
    %51 = vector.shape_cast %50 : vector<2x1x128xf32> to vector<2x1x128xf32>
    %52 = vector.broadcast %51 : vector<2x1x128xf32> to vector<2x8x128xf32>
    %53 = vector.shape_cast %52 : vector<2x8x128xf32> to vector<16x128xf32>
    %54 = vector.shape_cast %31 : vector<16x16xf32> to vector<2x8x16xf32>
    %55 = vector.extract_strided_slice %54 {offsets = [0, 0, 0], sizes = [2, 1, 16], strides = [1, 1, 1]} : vector<2x8x16xf32> to vector<2x1x16xf32>
    %56 = vector.shape_cast %55 : vector<2x1x16xf32> to vector<2x16xf32>
    %57 = vector.extract_strided_slice %54 {offsets = [0, 1, 0], sizes = [2, 1, 16], strides = [1, 1, 1]} : vector<2x8x16xf32> to vector<2x1x16xf32>
    %58 = vector.shape_cast %57 : vector<2x1x16xf32> to vector<2x16xf32>
    %59 = vector.extract_strided_slice %54 {offsets = [0, 2, 0], sizes = [2, 1, 16], strides = [1, 1, 1]} : vector<2x8x16xf32> to vector<2x1x16xf32>
    %60 = vector.shape_cast %59 : vector<2x1x16xf32> to vector<2x16xf32>
    %61 = vector.extract_strided_slice %54 {offsets = [0, 3, 0], sizes = [2, 1, 16], strides = [1, 1, 1]} : vector<2x8x16xf32> to vector<2x1x16xf32>
    %62 = vector.shape_cast %61 : vector<2x1x16xf32> to vector<2x16xf32>
    %63 = vector.extract_strided_slice %54 {offsets = [0, 4, 0], sizes = [2, 1, 16], strides = [1, 1, 1]} : vector<2x8x16xf32> to vector<2x1x16xf32>
    %64 = vector.shape_cast %63 : vector<2x1x16xf32> to vector<2x16xf32>
    %65 = vector.extract_strided_slice %54 {offsets = [0, 5, 0], sizes = [2, 1, 16], strides = [1, 1, 1]} : vector<2x8x16xf32> to vector<2x1x16xf32>
    %66 = vector.shape_cast %65 : vector<2x1x16xf32> to vector<2x16xf32>
    %67 = vector.extract_strided_slice %54 {offsets = [0, 6, 0], sizes = [2, 1, 16], strides = [1, 1, 1]} : vector<2x8x16xf32> to vector<2x1x16xf32>
    %68 = vector.shape_cast %67 : vector<2x1x16xf32> to vector<2x16xf32>
    %69 = vector.extract_strided_slice %54 {offsets = [0, 7, 0], sizes = [2, 1, 16], strides = [1, 1, 1]} : vector<2x8x16xf32> to vector<2x1x16xf32>
    %70 = vector.shape_cast %69 : vector<2x1x16xf32> to vector<2x16xf32>
    %71 = tpu.concatenate %56, %58, %60, %62, %64, %66, %68, %70 in 1 : vector<2x16xf32>, vector<2x16xf32>, vector<2x16xf32>, vector<2x16xf32>, vector<2x16xf32>, vector<2x16xf32>, vector<2x16xf32>, vector<2x16xf32> -> vector<2x128xf32>
    %72 = vector.shape_cast %71 : vector<2x128xf32> to vector<2x1x128xf32>
    %73 = vector.shape_cast %72 : vector<2x1x128xf32> to vector<2x1x128xf32>
    %74 = vector.broadcast %73 : vector<2x1x128xf32> to vector<2x8x128xf32>
    %75 = vector.shape_cast %74 : vector<2x8x128xf32> to vector<16x128xf32>
    %76 = tpu.iota {dimensions = array<i32: 1>} : vector<16x128xi32>
    %77 = arith.mulf %29, %53 : vector<16x128xf32>
    %78 = vector.extract_strided_slice %77 {offsets = [0, 1], sizes = [16, 127], strides = [1, 1]} : vector<16x128xf32> to vector<16x127xf32>
    %79 = vector.extract_strided_slice %77 {offsets = [0, 0], sizes = [16, 1], strides = [1, 1]} : vector<16x128xf32> to vector<16x1xf32>
    %80 = tpu.concatenate %78, %79 in 1 : vector<16x127xf32>, vector<16x1xf32> -> vector<16x128xf32>
    %81 = vector.extract_strided_slice %77 {offsets = [0, 127], sizes = [16, 1], strides = [1, 1]} : vector<16x128xf32> to vector<16x1xf32>
    %82 = vector.extract_strided_slice %77 {offsets = [0, 0], sizes = [16, 127], strides = [1, 1]} : vector<16x128xf32> to vector<16x127xf32>
    %83 = tpu.concatenate %81, %82 in 1 : vector<16x1xf32>, vector<16x127xf32> -> vector<16x128xf32>
    %c1_i32 = arith.constant 1 : i32
    %84 = vector.broadcast %c1_i32 : i32 to vector<16x128xi32>
    %85 = arith.andi %76, %84 : vector<16x128xi32>
    %c0_i32 = arith.constant 0 : i32
    %86 = vector.broadcast %c0_i32 : i32 to vector<16x128xi32>
    %87 = arith.cmpi eq, %85, %86 : vector<16x128xi32>
    %88 = arith.select %87, %80, %83 : vector<16x128xi1>, vector<16x128xf32>
    %89 = arith.addf %77, %88 : vector<16x128xf32>
    %90 = vector.extract_strided_slice %89 {offsets = [0, 16], sizes = [16, 112], strides = [1, 1]} : vector<16x128xf32> to vector<16x112xf32>
    %91 = vector.extract_strided_slice %89 {offsets = [0, 0], sizes = [16, 16], strides = [1, 1]} : vector<16x128xf32> to vector<16x16xf32>
    %92 = tpu.concatenate %90, %91 in 1 : vector<16x112xf32>, vector<16x16xf32> -> vector<16x128xf32>
    %93 = vector.extract_strided_slice %89 {offsets = [0, 112], sizes = [16, 16], strides = [1, 1]} : vector<16x128xf32> to vector<16x16xf32>
    %94 = vector.extract_strided_slice %89 {offsets = [0, 0], sizes = [16, 112], strides = [1, 1]} : vector<16x128xf32> to vector<16x112xf32>
    %95 = tpu.concatenate %93, %94 in 1 : vector<16x16xf32>, vector<16x112xf32> -> vector<16x128xf32>
    %c16_i32 = arith.constant 16 : i32
    %96 = vector.broadcast %c16_i32 : i32 to vector<16x128xi32>
    %97 = arith.andi %76, %96 : vector<16x128xi32>
    %c0_i32_13 = arith.constant 0 : i32
    %98 = vector.broadcast %c0_i32_13 : i32 to vector<16x128xi32>
    %99 = arith.cmpi eq, %97, %98 : vector<16x128xi32>
    %100 = arith.select %99, %92, %95 : vector<16x128xi1>, vector<16x128xf32>
    %101 = arith.maximumf %89, %100 : vector<16x128xf32>
    %102 = vector.extract_strided_slice %101 {offsets = [0, 32], sizes = [16, 96], strides = [1, 1]} : vector<16x128xf32> to vector<16x96xf32>
    %103 = vector.extract_strided_slice %101 {offsets = [0, 0], sizes = [16, 32], strides = [1, 1]} : vector<16x128xf32> to vector<16x32xf32>
    %104 = tpu.concatenate %102, %103 in 1 : vector<16x96xf32>, vector<16x32xf32> -> vector<16x128xf32>
    %105 = vector.extract_strided_slice %101 {offsets = [0, 96], sizes = [16, 32], strides = [1, 1]} : vector<16x128xf32> to vector<16x32xf32>
    %106 = vector.extract_strided_slice %101 {offsets = [0, 0], sizes = [16, 96], strides = [1, 1]} : vector<16x128xf32> to vector<16x96xf32>
    %107 = tpu.concatenate %105, %106 in 1 : vector<16x32xf32>, vector<16x96xf32> -> vector<16x128xf32>
    %c32_i32 = arith.constant 32 : i32
    %108 = vector.broadcast %c32_i32 : i32 to vector<16x128xi32>
    %109 = arith.andi %76, %108 : vector<16x128xi32>
    %c0_i32_14 = arith.constant 0 : i32
    %110 = vector.broadcast %c0_i32_14 : i32 to vector<16x128xi32>
    %111 = arith.cmpi eq, %109, %110 : vector<16x128xi32>
    %112 = arith.select %111, %104, %107 : vector<16x128xi1>, vector<16x128xf32>
    %113 = arith.maximumf %101, %112 : vector<16x128xf32>
    %114 = vector.extract_strided_slice %113 {offsets = [0, 64], sizes = [16, 64], strides = [1, 1]} : vector<16x128xf32> to vector<16x64xf32>
    %115 = vector.extract_strided_slice %113 {offsets = [0, 0], sizes = [16, 64], strides = [1, 1]} : vector<16x128xf32> to vector<16x64xf32>
    %116 = tpu.concatenate %114, %115 in 1 : vector<16x64xf32>, vector<16x64xf32> -> vector<16x128xf32>
    %117 = vector.extract_strided_slice %113 {offsets = [0, 64], sizes = [16, 64], strides = [1, 1]} : vector<16x128xf32> to vector<16x64xf32>
    %118 = vector.extract_strided_slice %113 {offsets = [0, 0], sizes = [16, 64], strides = [1, 1]} : vector<16x128xf32> to vector<16x64xf32>
    %119 = tpu.concatenate %117, %118 in 1 : vector<16x64xf32>, vector<16x64xf32> -> vector<16x128xf32>
    %c64_i32 = arith.constant 64 : i32
    %120 = vector.broadcast %c64_i32 : i32 to vector<16x128xi32>
    %121 = arith.andi %76, %120 : vector<16x128xi32>
    %c0_i32_15 = arith.constant 0 : i32
    %122 = vector.broadcast %c0_i32_15 : i32 to vector<16x128xi32>
    %123 = arith.cmpi eq, %121, %122 : vector<16x128xi32>
    %124 = arith.select %123, %116, %119 : vector<16x128xi1>, vector<16x128xf32>
    %125 = arith.maximumf %113, %124 : vector<16x128xf32>
    %126 = arith.subf %89, %125 : vector<16x128xf32>
    %127 = math.exp %126 : vector<16x128xf32>
    %128 = vector.extract_strided_slice %127 {offsets = [0, 16], sizes = [16, 112], strides = [1, 1]} : vector<16x128xf32> to vector<16x112xf32>
    %129 = vector.extract_strided_slice %127 {offsets = [0, 0], sizes = [16, 16], strides = [1, 1]} : vector<16x128xf32> to vector<16x16xf32>
    %130 = tpu.concatenate %128, %129 in 1 : vector<16x112xf32>, vector<16x16xf32> -> vector<16x128xf32>
    %131 = vector.extract_strided_slice %127 {offsets = [0, 112], sizes = [16, 16], strides = [1, 1]} : vector<16x128xf32> to vector<16x16xf32>
    %132 = vector.extract_strided_slice %127 {offsets = [0, 0], sizes = [16, 112], strides = [1, 1]} : vector<16x128xf32> to vector<16x112xf32>
    %133 = tpu.concatenate %131, %132 in 1 : vector<16x16xf32>, vector<16x112xf32> -> vector<16x128xf32>
    %c16_i32_16 = arith.constant 16 : i32
    %134 = vector.broadcast %c16_i32_16 : i32 to vector<16x128xi32>
    %135 = arith.andi %76, %134 : vector<16x128xi32>
    %c0_i32_17 = arith.constant 0 : i32
    %136 = vector.broadcast %c0_i32_17 : i32 to vector<16x128xi32>
    %137 = arith.cmpi eq, %135, %136 : vector<16x128xi32>
    %138 = arith.select %137, %130, %133 : vector<16x128xi1>, vector<16x128xf32>
    %139 = arith.addf %127, %138 : vector<16x128xf32>
    %140 = vector.extract_strided_slice %139 {offsets = [0, 32], sizes = [16, 96], strides = [1, 1]} : vector<16x128xf32> to vector<16x96xf32>
    %141 = vector.extract_strided_slice %139 {offsets = [0, 0], sizes = [16, 32], strides = [1, 1]} : vector<16x128xf32> to vector<16x32xf32>
    %142 = tpu.concatenate %140, %141 in 1 : vector<16x96xf32>, vector<16x32xf32> -> vector<16x128xf32>
    %143 = vector.extract_strided_slice %139 {offsets = [0, 96], sizes = [16, 32], strides = [1, 1]} : vector<16x128xf32> to vector<16x32xf32>
    %144 = vector.extract_strided_slice %139 {offsets = [0, 0], sizes = [16, 96], strides = [1, 1]} : vector<16x128xf32> to vector<16x96xf32>
    %145 = tpu.concatenate %143, %144 in 1 : vector<16x32xf32>, vector<16x96xf32> -> vector<16x128xf32>
    %c32_i32_18 = arith.constant 32 : i32
    %146 = vector.broadcast %c32_i32_18 : i32 to vector<16x128xi32>
    %147 = arith.andi %76, %146 : vector<16x128xi32>
    %c0_i32_19 = arith.constant 0 : i32
    %148 = vector.broadcast %c0_i32_19 : i32 to vector<16x128xi32>
    %149 = arith.cmpi eq, %147, %148 : vector<16x128xi32>
    %150 = arith.select %149, %142, %145 : vector<16x128xi1>, vector<16x128xf32>
    %151 = arith.addf %139, %150 : vector<16x128xf32>
    %152 = vector.extract_strided_slice %151 {offsets = [0, 64], sizes = [16, 64], strides = [1, 1]} : vector<16x128xf32> to vector<16x64xf32>
    %153 = vector.extract_strided_slice %151 {offsets = [0, 0], sizes = [16, 64], strides = [1, 1]} : vector<16x128xf32> to vector<16x64xf32>
    %154 = tpu.concatenate %152, %153 in 1 : vector<16x64xf32>, vector<16x64xf32> -> vector<16x128xf32>
    %155 = vector.extract_strided_slice %151 {offsets = [0, 64], sizes = [16, 64], strides = [1, 1]} : vector<16x128xf32> to vector<16x64xf32>
    %156 = vector.extract_strided_slice %151 {offsets = [0, 0], sizes = [16, 64], strides = [1, 1]} : vector<16x128xf32> to vector<16x64xf32>
    %157 = tpu.concatenate %155, %156 in 1 : vector<16x64xf32>, vector<16x64xf32> -> vector<16x128xf32>
    %c64_i32_20 = arith.constant 64 : i32
    %158 = vector.broadcast %c64_i32_20 : i32 to vector<16x128xi32>
    %159 = arith.andi %76, %158 : vector<16x128xi32>
    %c0_i32_21 = arith.constant 0 : i32
    %160 = vector.broadcast %c0_i32_21 : i32 to vector<16x128xi32>
    %161 = arith.cmpi eq, %159, %160 : vector<16x128xi32>
    %162 = arith.select %161, %154, %157 : vector<16x128xi1>, vector<16x128xf32>
    %163 = arith.addf %151, %162 : vector<16x128xf32>
    %164 = tpu.reciprocal %163 {approx = true} : vector<16x128xf32> -> vector<16x128xf32>
    %165 = arith.mulf %127, %164 : vector<16x128xf32>
    %166 = arith.mulf %165, %75 : vector<16x128xf32>
    %167 = arith.truncf %166 : vector<16x128xf32> to vector<16x128xbf16>
    %c0_22 = arith.constant 0 : index
    %c0_23 = arith.constant 0 : index
    %168 = vector.load %arg5[%c0_22, %c0_23] : memref<128x128xbf16, #tpu.memory_space<vmem>>, vector<128x128xbf16>
    %cst_24 = arith.constant dense<0.000000e+00> : vector<16x128xf32>
    %169 = tpu.matmul %167, %168, %cst_24 {dimension_numbers = #tpu.dot_dimension_numbers<[1], [0], [0], [1], [0, 0, 1, 1], [], []>} : vector<16x128xbf16>, vector<128x128xbf16>, vector<16x128xf32> -> vector<16x128xf32>
    %c0_25 = arith.constant 0 : index
    %c0_26 = arith.constant 0 : index
    %170 = vector.load %arg6[%c0_25, %c0_26] : memref<1x128xf32, #tpu.memory_space<vmem>>, vector<1x128xf32>
    %171 = vector.broadcast %170 : vector<1x128xf32> to vector<16x128xf32>
    %172 = arith.addf %169, %171 : vector<16x128xf32>
    %173 = vector.shape_cast %172 : vector<16x128xf32> to vector<2x8x128xf32>
    %c0_27 = arith.constant 0 : index
    %c0_28 = arith.constant 0 : index
    %c0_29 = arith.constant 0 : index
    %174 = vector.load %arg7[%c0_27, %c0_28, %c0_29] : memref<2x8x128xf32, #tpu.memory_space<vmem>>, vector<2x8x128xf32>
    tpu.vector_store %arg7[%c0_27, %c0_28, %c0_29], %173 {strides = array<i32>} : memref<2x8x128xf32, #tpu.memory_space<vmem>>, vector<2x8x128xf32>,
    return
  }
  func.func @transform_0(%arg0: i32) -> (i32, i32, i32) {
    %c0_i32 = arith.constant 0 : i32
    %c0_i32_0 = arith.constant 0 : i32
    %c0_i32_1 = arith.constant 0 : i32
    return %arg0, %c0_i32, %c0_i32_0 : i32, i32, i32
  }
  func.func @transform_1(%arg0: i32) -> (i32, i32) {
    %c0_i32 = arith.constant 0 : i32
    %c0_i32_0 = arith.constant 0 : i32
    %c0_i32_1 = arith.constant 0 : i32
    return %c0_i32, %c0_i32_0 : i32, i32
  }
  func.func @transform_2(%arg0: i32) -> (i32, i32) {
    %c0_i32 = arith.constant 0 : i32
    %c0_i32_0 = arith.constant 0 : i32
    %c0_i32_1 = arith.constant 0 : i32
    return %c0_i32, %c0_i32_0 : i32, i32
  }
  func.func @transform_3(%arg0: i32) -> (i32, i32) {
    %c0_i32 = arith.constant 0 : i32
    %c0_i32_0 = arith.constant 0 : i32
    %c0_i32_1 = arith.constant 0 : i32
    return %c0_i32, %c0_i32_0 : i32, i32
  }
  func.func @transform_4(%arg0: i32) -> (i32, i32) {
    %c0_i32 = arith.constant 0 : i32
    %c0_i32_0 = arith.constant 0 : i32
    %c0_i32_1 = arith.constant 0 : i32
    return %c0_i32, %c0_i32_0 : i32, i32
  }
  func.func @transform_5(%arg0: i32) -> (i32, i32) {
    %c0_i32 = arith.constant 0 : i32
    %c0_i32_0 = arith.constant 0 : i32
    %c0_i32_1 = arith.constant 0 : i32
    return %c0_i32, %c0_i32_0 : i32, i32
  }
  func.func @transform_6(%arg0: i32) -> (i32, i32, i32) {
    %c0_i32 = arith.constant 0 : i32
    %c0_i32_0 = arith.constant 0 : i32
    %c0_i32_1 = arith.constant 0 : i32
    return %arg0, %c0_i32, %c0_i32_0 : i32, i32, i32
  }
}

</mosaic_0001>

<bundles_post_ra>
// kernel: tpu_custom_call.1
= control target key start
LH: loop header
LB: loop body
LE: loop exit
PB: predicated region body
PF: predicated region fallthrough
CT: control target
= control target key end

     0   :  { %s1061_s0 = inlined_call_operand.vmem [shape: f32[2,8,128], index: 0, kind: input, shape index: {}]   ;;  %s1062_s1 = inlined_call_operand.vmem [shape: f32[1,128], index: 1, kind: input, shape index: {}]   ;;  %s1063_s2 = inlined_call_operand.vmem [shape: f32[1,128], index: 2, kind: input, shape index: {}]   ;;  %s1064_s3 = inlined_call_operand.vmem [shape: bf16[128,160], index: 3, kind: input, shape index: {}]   ;;  %s1065_s4 = inlined_call_operand.vmem [shape: bf16[128,128], index: 4, kind: input, shape index: {}]   ;;  %s1066_s5 = inlined_call_operand.vmem [shape: f32[1,128], index: 5, kind: input, shape index: {}]   ;;  %s1067_s6 = inlined_call_operand.hbm [shape: f32[2,8,128], index: 6, kind: output, shape index: {}]  }
   0x1   :  { %v25_v0 = vld [vmem:[%s1061_s0] sm:$0xff]  ;;  %v26_v1 = vld [vmem:[%s1061_s0 + $0x8] sm:$0xff] }
   0x2   :  { %27 = vadd.xlane.f32.xlu0 %v25_v0 }
   0x6   :  { %29 = vadd.xlane.f32.xlu0 %v26_v1 }
   0x7   :  { %11 = vsyncpa [#allocation3], 0  ;;  %v699_v2 = vld [vmem:[%s1064_s3 + $0x4] ss:$8 sps:$4 sm:$0xff]   ;;  %v701_v3 = vld [vmem:[%s1064_s3] ss:$8 sps:$4 sm:$0xff]  }
   0x8   :  { %v702_v4 = vld [vmem:[%s1064_s3 + $0x14] ss:$8 sps:$4 sm:$0xff]   ;;  %165 = vmatprep.subr.bf16.mxu0 %v699_v2  ;;  %v704_v13 = vld [vmem:[%s1064_s3 + $0x10] ss:$8 sps:$4 sm:$0xff]   ;;  %v705_v14 = vld [vmem:[%s1064_s3 + $0x24] ss:$8 sps:$4 sm:$0xff]  }
   0x9   :  { %166 = vmatpush1.bf16.msra.mxu0 %v701_v3  ;;  %v707_v15 = vld [vmem:[%s1064_s3 + $0x20] ss:$8 sps:$4 sm:$0xff]   ;;  %v708_v16 = vld [vmem:[%s1064_s3 + $0x34] ss:$8 sps:$4 sm:$0xff]   ;;  %v710_v17 = vld [vmem:[%s1064_s3 + $0x30] ss:$8 sps:$4 sm:$0xff]  }
   0xa   :  { %167 = vmatprep.subr.bf16.mxu0 %v702_v4  ;;  %v711_v18 = vld [vmem:[%s1064_s3 + $0x44] ss:$8 sps:$4 sm:$0xff]   ;;  %v713_v19 = vld [vmem:[%s1064_s3 + $0x40] ss:$8 sps:$4 sm:$0xff]   ;;  %v714_v20 = vld [vmem:[%s1064_s3 + $0x54] ss:$8 sps:$4 sm:$0xff]  }
   0xb   :  { %v767_v21 = vmov 0   ;;  %v716_v22 = vld [vmem:[%s1064_s3 + $0x50] ss:$8 sps:$4 sm:$0xff]   ;;  %v717_v23 = vld [vmem:[%s1064_s3 + $0x64] ss:$8 sps:$4 sm:$0xff]   ;;  %vm211_vm0 = vcmask 1041409  }
   0xc   :  { %197 = vmatprep.mubr.bf16.mxu0 %v767_v21  ;;  %v719_v24 = vld [vmem:[%s1064_s3 + $0x60] ss:$8 sps:$4 sm:$0xff]   ;;  %v720_v25 = vld [vmem:[%s1064_s3 + $0x74] ss:$8 sps:$4 sm:$0xff]   ;;  %v722_v26 = vld [vmem:[%s1064_s3 + $0x70] ss:$8 sps:$4 sm:$0xff]  }
   0xd   :  { %168 = vmatpush1.bf16.msra.mxu0 %v704_v13  ;;  %v627_v35 = vld [vmem:[%s1062_s1] ss:$0 sm:$0xff]  ;;  %s768_s1 = smov 16   ;;  %s770_s10 = smov 80   ;;  %vm255_vm1 = vcmask 130048   ;;  %vm257_vm2 = vcmask 261120  }
   0xe   :  { %169 = vmatprep.subr.bf16.mxu0 %v705_v14  ;;  %v628_v39 = vld [vmem:[%s1063_s2] ss:$0 sm:$0xff]  ;;  %s769_s2 = smov 32   ;;  %s771_s11 = smov 48   ;;  %vm259_vm3 = vcmask 392192   ;;  %vm261_vm4 = vcmask 523264  }
   0xf   :  { %s772_s12 = smov 112   ;;  %s773_s13 = smov 64   ;;  %vm263_vm5 = vcmask 654336   ;;  %vm265_vm6 = vcmask 785408   ;;  %vm267_vm7 = vcmask 916480   ;;  %vm779_vm11 = vmmov 0  }
  0x10   :  { %s774_s14 = smov 96   ;;  %s776_s15 = smov 127  }
  0x11   :  { %170 = vmatpush1.bf16.msra.mxu0 %v707_v15  ;;  %s777_s16 = smov 1   ;;  %s780_s3 = smov [#allocation2]  }
  0x12   :  { %171 = vmatprep.subr.bf16.mxu0 %v708_v16  ;;  %s616_s9 = sshll.u32 %s780_s3, 4  ;;  %s617_s9 = int_to_ptr.vmem [resolvable:$true] %s616_s9 }
  0x13   :  { %p748_p1 = scmp.lt.s32.totalorder %s617_s9, %s617_s9 }
  0x15   :  { %172 = vmatpush1.bf16.msra.mxu0 %v710_v17 }
  0x16   :  { %173 = vmatprep.subr.bf16.mxu0 %v711_v18 }
  0x19   :  { %174 = vmatpush1.bf16.msra.mxu0 %v713_v19 }
  0x1a   :  { %175 = vmatprep.subr.bf16.mxu0 %v714_v20 }
  0x1d   :  { %176 = vmatpush1.bf16.msra.mxu0 %v716_v22 }
  0x1e   :  { %177 = vmatprep.subr.bf16.mxu0 %v717_v23 }
  0x21   :  { %178 = vmatpush1.bf16.msra.mxu0 %v719_v24 }
  0x22   :  { %179 = vmatprep.subr.bf16.mxu0 %v720_v25 }
  0x25   :  { %180 = vmatpush1.bf16.msra.mxu0 %v722_v26 }
  0x8f   :  { %v28_v5 = vpop.xlane.xlu0 %27 }
  0x90   :  { %v32_v6 = vmul.f32 0.0078125, %v28_v5 }
  0x92   :  { %v34_v7 = vsub.f32 %v25_v0, %v32_v6 }
  0x93   :  { %v30_v8 = vpop.xlane.xlu0 %29 }
  0x94   :  { %v33_v9 = vmul.f32 0.0078125, %v30_v8  ;;  %v36_v10 = vmul.f32 %v34_v7, %v34_v7  ;;  %v775_v8 = vmov 1966171168  }
  0x96   :  { %v35_v11 = vsub.f32 %v26_v1, %v33_v9  ;;  %38 = vadd.xlane.f32.xlu1 %v36_v10  ;;  %v271_v9 = vunpack.c.l.s4 %v775_v8  ;;  %v273_v10 = vlaneseq }
  0x98   :  { %v37_v12 = vmul.f32 %v35_v11, %v35_v11  ;;  %v272_v15 = vunpack.c.0.s8 %v271_v9  ;;  %v274_v16 = vshrl.u32 %v273_v10, 7 }
  0x9a   :  { %40 = vadd.xlane.f32.xlu1 %v37_v12  ;;  %v925_v20 = vsub.s32 %v272_v15, %v274_v16 }
 0x123   :  { %v39_v27 = vpop.xlane.xlu1 %38 }
 0x124   :  { %v42_v28 = vmul.f32 0.0078125, %v39_v27  ;;  %v931_v27 = vsub.s32 0, %v274_v16 }
 0x126   :  { %v44_v29 = vadd.f32 1e-05, %v42_v28 }
 0x127   :  { %v41_v30 = vpop.xlane.xlu1 %40 }
 0x128   :  { %731 = vrsqrt.f32 %v44_v29  ;;  %v43_v31 = vmul.f32 0.0078125, %v41_v30 }
 0x12a   :  { %v45_v32 = vadd.f32 1e-05, %v43_v31 }
 0x12c   :  { %733 = vrsqrt.f32 %v45_v32 }
 0x132   :  { %v732_v33 = vpop.eup %731 }
 0x133   :  { %v48_v34 = vmul.f32 %v732_v33, %v34_v7 }
 0x135   :  { %v57_v38 = vmul.f32 %v627_v35, %v48_v34 }
 0x136   :  { %v734_v36 = vpop.eup %733 }
 0x137   :  { %v49_v37 = vmul.f32 %v734_v36, %v35_v11  ;;  %v66_v41 = vadd.f32 %v628_v39, %v57_v38 }
 0x139   :  { %v58_v40 = vmul.f32 %v627_v35, %v49_v37  ;;  %v365_v35 = vand.u32 127, %v273_v10 }
 0x13b   :  { %v67_v42 = vadd.f32 %v628_v39, %v58_v40  ;;  %v382_v36 = vand.u32 1, %v365_v35 }
 0x13d   :  { %v68_v43 = vpack.c.bf16 %v67_v42, %v66_v41  ;;  %vm383_vm8 = vcmp.eq.s32.totalorder %v382_v36, 0 }
 0x13f   :  { %198 = vmatmul.mubr.bf16.vlgmr.msra.gmra.mrb[0].mxu0 %v68_v43 }
 0x212   :  { %v878_v44 = vpop.f32.mrb[0].mxu0 }
 0x213   :  { %v201_v45 = vpop.f32.mrb[1].mxu0 }
 0x214   :  { %v880_v46 = vpop.f32.mrb[2].mxu0  ;;  %v214_v47 = vrot.slane %v201_v45, 1  ;;  %v219_v48 = vrot.slane %v201_v45, 2  ;;  %v237_v49 = vrot.slane %v201_v45, 5  ;;  %v225_v51 = vrot.slane %v201_v45, 3 }
 0x215   :  { %v205_v50 = vpop.f32.mrb[3].mxu0  ;;  %v249_v52 = vrot.slane %v201_v45, 7  ;;  %v231_v53 = vrot.slane %v201_v45, 4  ;;  %v243_v54 = vrot.slane %v201_v45, 6 }
 0x216   :  { %v883_v55 = vsel %vm211_vm0, %v205_v50, %v214_v47  ;;  %v220_v56 = vrot.slane %v205_v50, 1  ;;  %v238_v57 = vrot.slane %v205_v50, 4  ;;  %v226_v58 = vrot.slane %v205_v50, 2 }
 0x217   :  { %216 = vrot.lane.b32.xlu0 %v883_v55, %s768_s1  ;;  %v250_v59 = vrot.slane %v205_v50, 6  ;;  %v232_v60 = vrot.slane %v205_v50, 3  ;;  %v244_v61 = vrot.slane %v205_v50, 5  ;;  %v210_v62 = vrot.slane %v205_v50, 7 }
 0x218   :  { %v888_v63 = vsel %vm211_vm0, %v220_v56, %v219_v48  ;;  %v891_v0 = vsel %vm211_vm0, %v238_v57, %v237_v49  ;;  %v894_v1 = vsel %vm211_vm0, %v226_v58, %v225_v51  ;;  %v422_v56 = vand.u32 32, %v365_v35 }
 0x219   :  { %222 = vrot.lane.b32.xlu1 %v888_v63, %s769_s2  ;;  %v899_v2 = vsel %vm211_vm0, %v250_v59, %v249_v52  ;;  %v902_v3 = vsel %vm211_vm0, %v232_v60, %v231_v53  ;;  %v905_v4 = vsel %vm211_vm0, %v244_v61, %v243_v54  ;;  %v908_v5 = vsel %vm211_vm0, %v210_v62, %v201_v45 }
 0x21a   :  { %v402_v45 = vand.u32 16, %v365_v35  ;;  %vm955_vm10 = vcmp.eq.s32.totalorder %v422_v56, 0 }
 0x21b   :  { %240 = vrot.lane.b32.xlu0 %v891_v0, %s770_s10 }
 0x21c   :  { %vm943_vm9 = vcmp.eq.s32.totalorder %v402_v45, 0 }
 0x21d   :  { %228 = vrot.lane.b32.xlu1 %v894_v1, %s771_s11 }
 0x21f   :  { %252 = vrot.lane.b32.xlu0 %v899_v2, %s772_s12 }
 0x221   :  { %234 = vrot.lane.b32.xlu1 %v902_v3, %s773_s13 }
 0x225   :  { %246 = vrot.lane.b32.xlu1 %v905_v4, %s774_s14 }
 0x289   :  { %v217_v7 = vpop.permute.xlu0 %216 }
 0x28a   :  { %v256_v11 = vsel %vm255_vm1, %v908_v5, %v217_v7 }
 0x28b   :  { %v223_v6 = vpop.permute.xlu1 %222 }
 0x28c   :  { %v258_v13 = vsel %vm257_vm2, %v256_v11, %v223_v6 }
 0x28d   :  { %v241_v14 = vpop.permute.xlu0 %240 }
 0x28f   :  { %v229_v12 = vpop.permute.xlu1 %228 }
 0x290   :  { %v260_v17 = vsel %vm259_vm3, %v258_v13, %v229_v12 }
 0x291   :  { %v253_v23 = vpop.permute.xlu0 %252 }
 0x293   :  { %v235_v18 = vpop.permute.xlu1 %234 }
 0x294   :  { %v262_v19 = vsel %vm261_vm4, %v260_v17, %v235_v18 }
 0x295   :  { %v264_v22 = vsel %vm263_vm5, %v262_v19, %v241_v14 }
 0x297   :  { %v247_v21 = vpop.permute.xlu1 %246 }
 0x298   :  { %v266_v24 = vsel %vm265_vm6, %v264_v22, %v247_v21 }
 0x299   :  { %v268_v25 = vsel %vm267_vm7, %v266_v24, %v253_v23 }
 0x29a   :  { %v276_v26 = vrot.slane %v268_v25, %v925_v20 }
 0x29c   :  { %v277_v28 = vcombine.high %v276_v26, %v276_v26  ;;  %v284_v29 = vrot.slane %v276_v26, %v925_v20 }
 0x29e   :  { %v295_v30 = vrot.slane %v284_v29, %v931_v27  ;;  %v291_v31 = vrot.slane %v277_v28, %v925_v20  ;;  %v723_v29 = vld [vmem:[%s1065_s4] sm:$0xff]  }
 0x2a0   :  { %v366_v32 = vmul.f32 %v295_v30, %v878_v44  ;;  %v299_v33 = vrot.slane %v291_v31, %v931_v27  ;;  %v778_v30 = vmov 0.0   ;;  %v724_v31 = vld [vmem:[%s1065_s4 + $0x8] sm:$0xff]  }
 0x2a1   :  { %663 = vmatprep.subr.bf16.mxu1 %v778_v30  ;;  %679 = vmatprep.mubr.msk.bf16.mxu1 %vm779_vm11, %v778_v30 }
 0x2a2   :  { %370 = vrot.lane.b32.xlu1 %v366_v32, %s776_s15  ;;  %v367_v34 = vmul.f32 %v299_v33, %v880_v46  ;;  %664 = vmatpush3.bf16.msra.mxu1 %v723_v29  ;;  %v726_v33 = vld [vmem:[%s1065_s4 + $0x18] sm:$0xff]  }
 0x2a3   :  { %665 = vmatprep.subr.bf16.mxu1 %v778_v30 }
 0x2a4   :  { %372 = vrot.lane.b32.xlu0 %v367_v34, %s776_s15 }
 0x2a6   :  { %376 = vrot.lane.b32.xlu1 %v366_v32, %s777_s16  ;;  %666 = vmatpush3.bf16.msra.mxu1 %v724_v31 }
 0x2a7   :  { %667 = vmatprep.subr.bf16.mxu1 %v778_v30 }
 0x2a8   :  { %378 = vrot.lane.b32.xlu0 %v367_v34, %s777_s16 }
 0x314   :  { %v371_v37 = vpop.permute.xlu1 %370 }
 0x316   :  { %v373_v38 = vpop.permute.xlu0 %372 }
 0x318   :  { %v377_v39 = vpop.permute.xlu1 %376 }
 0x319   :  { %v384_v40 = vsel %vm383_vm8, %v371_v37, %v377_v39 }
 0x31a   :  { %v386_v41 = vadd.f32 %v384_v40, %v366_v32  ;;  %v379_v42 = vpop.permute.xlu0 %378  ;;  %v725_v32 = vld [vmem:[%s1065_s4 + $0x10] sm:$0xff]  }
 0x31b   :  { %v385_v43 = vsel %vm383_vm8, %v373_v38, %v379_v42  ;;  %668 = vmatpush3.bf16.msra.mxu1 %v725_v32  ;;  %v728_v38 = vld [vmem:[%s1065_s4 + $0x28] sm:$0xff]   ;;  %v730_v42 = vld [vmem:[%s1065_s4 + $0x38] sm:$0xff]  }
 0x31c   :  { %v387_v44 = vadd.f32 %v385_v43, %v367_v34  ;;  %390 = vrot.lane.b32.xlu1 %v386_v41, %s772_s12  ;;  %669 = vmatprep.subr.bf16.mxu1 %v778_v30 }
 0x31e   :  { %392 = vrot.lane.b32.xlu0 %v387_v44, %s772_s12 }
 0x31f   :  { %670 = vmatpush3.bf16.msra.mxu1 %v726_v33 }
 0x320   :  { %396 = vrot.lane.b32.xlu1 %v386_v41, %s768_s1  ;;  %671 = vmatprep.subr.bf16.mxu1 %v778_v30 }
 0x322   :  { %398 = vrot.lane.b32.xlu0 %v387_v44, %s768_s1 }
 0x38e   :  { %v391_v46 = vpop.permute.xlu1 %390 }
 0x390   :  { %v393_v47 = vpop.permute.xlu0 %392 }
 0x392   :  { %v397_v49 = vpop.permute.xlu1 %396 }
 0x393   :  { %v404_v50 = vsel %vm943_vm9, %v391_v46, %v397_v49 }
 0x394   :  { %v406_v51 = vmax.f32 %v386_v41, %v404_v50  ;;  %v399_v52 = vpop.permute.xlu0 %398 }
 0x395   :  { %v405_v53 = vsel %vm943_vm9, %v393_v47, %v399_v52 }
 0x396   :  { %v407_v54 = vmax.f32 %v387_v44, %v405_v53  ;;  %410 = vrot.lane.b32.xlu1 %v406_v51, %s774_s14 }
 0x398   :  { %412 = vrot.lane.b32.xlu0 %v407_v54, %s774_s14 }
 0x39a   :  { %416 = vrot.lane.b32.xlu1 %v406_v51, %s769_s2 }
 0x39c   :  { %418 = vrot.lane.b32.xlu0 %v407_v54, %s769_s2 }
 0x408   :  { %v411_v57 = vpop.permute.xlu1 %410 }
 0x40a   :  { %v413_v58 = vpop.permute.xlu0 %412 }
 0x40c   :  { %v417_v60 = vpop.permute.xlu1 %416 }
 0x40d   :  { %v424_v61 = vsel %vm955_vm10, %v411_v57, %v417_v60 }
 0x40e   :  { %v426_v62 = vmax.f32 %v406_v51, %v424_v61  ;;  %v419_v6 = vpop.permute.xlu0 %418 }
 0x40f   :  { %v425_v7 = vsel %vm955_vm10, %v413_v58, %v419_v6 }
 0x410   :  { %v427_v8 = vmax.f32 %v407_v54, %v425_v7  ;;  %430 = vrot.lane.b32.xlu1 %v426_v62, %s773_s13 }
 0x412   :  { %432 = vrot.lane.b32.xlu0 %v427_v8, %s773_s13 }
 0x482   :  { %v431_v9 = vpop.permute.xlu1 %430 }
 0x483   :  { %v436_v10 = vmax.f32 %v426_v62, %v431_v9 }
 0x484   :  { %v433_v11 = vpop.permute.xlu0 %432 }
 0x485   :  { %v438_v12 = vsub.f32 %v386_v41, %v436_v10  ;;  %v437_v13 = vmax.f32 %v427_v8, %v433_v11  ;;  %v729_v41 = vld [vmem:[%s1065_s4 + $0x30] sm:$0xff]  }
 0x487   :  { %v440_v14 = vmul.f32 1.442695, %v438_v12  ;;  %v439_v15 = vsub.f32 %v387_v44, %v437_v13  ;;  %v645_v13 = vld [vmem:[%s1066_s5] ss:$0 sm:$0xff] }
 0x489   :  { %735 = vpow2.f32 %v440_v14  ;;  %v442_v16 = vmul.f32 1.442695, %v439_v15 }
 0x48b   :  { %737 = vpow2.f32 %v442_v16 }
 0x493   :  { %v965_v17 = vpop.eup %735 }
 0x494   :  { %446 = vrot.lane.b32.xlu1 %v965_v17, %s772_s12 }
 0x495   :  { %v969_v18 = vpop.eup %737 }
 0x496   :  { %448 = vrot.lane.b32.xlu0 %v969_v18, %s772_s12 }
 0x498   :  { %452 = vrot.lane.b32.xlu1 %v965_v17, %s768_s1 }
 0x49a   :  { %454 = vrot.lane.b32.xlu0 %v969_v18, %s768_s1 }
 0x506   :  { %v447_v19 = vpop.permute.xlu1 %446 }
 0x508   :  { %v449_v21 = vpop.permute.xlu0 %448 }
 0x50a   :  { %v453_v22 = vpop.permute.xlu1 %452 }
 0x50b   :  { %v458_v23 = vsel %vm943_vm9, %v447_v19, %v453_v22 }
 0x50c   :  { %v460_v24 = vadd.f32 %v965_v17, %v458_v23  ;;  %v455_v25 = vpop.permute.xlu0 %454 }
 0x50d   :  { %v459_v26 = vsel %vm943_vm9, %v449_v21, %v455_v25 }
 0x50e   :  { %v461_v28 = vadd.f32 %v969_v18, %v459_v26  ;;  %464 = vrot.lane.b32.xlu1 %v460_v24, %s774_s14 }
 0x510   :  { %466 = vrot.lane.b32.xlu0 %v461_v28, %s774_s14 }
 0x512   :  { %470 = vrot.lane.b32.xlu1 %v460_v24, %s769_s2 }
 0x514   :  { %472 = vrot.lane.b32.xlu0 %v461_v28, %s769_s2 }
 0x516   :  { %302 = vrot.lane.b32.xlu1 %v908_v5, %s772_s12 }
 0x518   :  { %306 = vrot.lane.b32.xlu0 %v888_v63, %s768_s1  ;;  %v727_v63 = vld [vmem:[%s1065_s4 + $0x20] sm:$0xff]   ;;  %s743_s1 = scalar_lea.vmem %s617_s9, 256 }
 0x519   :  { %672 = vmatpush3.bf16.msra.mxu1 %v727_v63  ;;  %p744_p0 = scmp.ne.s32.totalorder %s617_s9, %s743_s1  ;;  %p749_p2 = scmp.lt.s32.totalorder %s743_s1, %s743_s1 }
 0x51a   :  { %309 = vrot.lane.b32.xlu1 %v894_v1, %s769_s2  ;;  %673 = vmatprep.subr.bf16.mxu1 %v778_v30 }
 0x51b   :  { %p750_p3 = por %p749_p2, %p748_p1 }
 0x51d   :  { %674 = vmatpush3.bf16.msra.mxu1 %v728_v38  ;;  %p751_p4 = pnand %p750_p3, %p744_p0 }
 0x51e   :  { %675 = vmatprep.subr.bf16.mxu1 %v778_v30 }
 0x521   :  { %676 = vmatpush3.bf16.msra.mxu1 %v729_v41 }
 0x522   :  { %677 = vmatprep.subr.bf16.mxu1 %v778_v30 }
 0x525   :  { %678 = vmatpush3.bf16.msra.mxu1 %v730_v42 }
 0x580   :  { %v465_v34 = vpop.permute.xlu1 %464 }
 0x582   :  { %v467_v5 = vpop.permute.xlu0 %466 }
 0x584   :  { %v471_v35 = vpop.permute.xlu1 %470 }
 0x585   :  { %v476_v1 = vsel %vm955_vm10, %v465_v34, %v471_v35 }
 0x586   :  { %v478_v36 = vadd.f32 %v476_v1, %v460_v24  ;;  %v473_v37 = vpop.permute.xlu0 %472 }
 0x587   :  { %v477_v39 = vsel %vm955_vm10, %v467_v5, %v473_v37 }
 0x588   :  { %v479_v40 = vadd.f32 %v477_v39, %v461_v28  ;;  %482 = vrot.lane.b32.xlu0 %v478_v36, %s773_s13  ;;  %v303_v43 = vpop.permute.xlu1 %302 }
 0x58a   :  { %484 = vrot.lane.b32.xlu1 %v479_v40, %s773_s13  ;;  %v307_v44 = vpop.permute.xlu0 %306 }
 0x58c   :  { %312 = vrot.lane.b32.xlu0 %v902_v3, %s771_s11  ;;  %v324_v3 = vsel %vm255_vm1, %v303_v43, %v883_v55  ;;  %v310_v45 = vpop.permute.xlu1 %309 }
 0x58d   :  { %v325_v47 = vsel %vm257_vm2, %v324_v3, %v307_v44 }
 0x58e   :  { %315 = vrot.lane.b32.xlu1 %v891_v0, %s773_s13  ;;  %v326_v0 = vsel %vm259_vm3, %v325_v47, %v310_v45 }
 0x590   :  { %318 = vrot.lane.b32.xlu0 %v905_v4, %s770_s10 }
 0x592   :  { %321 = vrot.lane.b32.xlu1 %v899_v2, %s774_s14 }
 0x5fa   :  { %v483_v46 = vpop.permute.xlu0 %482 }
 0x5fb   :  { %v488_v48 = vadd.f32 %v483_v46, %v478_v36 }
 0x5fc   :  { %v485_v49 = vpop.permute.xlu1 %484 }
 0x5fd   :  { %v489_v50 = vadd.f32 %v485_v49, %v479_v40  ;;  %739 = vrcp.f32 %v488_v48 }
 0x5fe   :  { %v313_v4 = vpop.permute.xlu0 %312 }
 0x5ff   :  { %741 = vrcp.f32 %v489_v50  ;;  %v327_v51 = vsel %vm261_vm4, %v326_v0, %v313_v4 }
 0x600   :  { %v316_v2 = vpop.permute.xlu1 %315 }
 0x601   :  { %v328_v52 = vsel %vm263_vm5, %v327_v51, %v316_v2 }
 0x602   :  { %v319_v53 = vpop.permute.xlu0 %318 }
 0x603   :  { %v329_v55 = vsel %vm265_vm6, %v328_v52, %v319_v53 }
 0x604   :  { %v322_v54 = vpop.permute.xlu1 %321 }
 0x605   :  { %v330_v56 = vsel %vm267_vm7, %v329_v55, %v322_v54 }
 0x606   :  { %v338_v57 = vrot.slane %v330_v56, %v925_v20 }
 0x607   :  { %v740_v58 = vpop.eup %739 }
 0x608   :  { %v339_v59 = vcombine.high %v338_v57, %v338_v57  ;;  %v346_v60 = vrot.slane %v338_v57, %v925_v20  ;;  %v492_v8 = vmul.f32 %v740_v58, %v965_v17 }
 0x609   :  { %v742_v61 = vpop.eup %741 }
 0x60a   :  { %v353_v62 = vrot.slane %v339_v59, %v925_v20  ;;  %v357_v6 = vrot.slane %v346_v60, %v931_v27  ;;  %v493_v9 = vmul.f32 %v742_v61, %v969_v18 }
 0x60c   :  { %v361_v7 = vrot.slane %v353_v62, %v931_v27  ;;  %v494_v10 = vmul.f32 %v492_v8, %v357_v6 }
 0x60e   :  { %v495_v11 = vmul.f32 %v493_v9, %v361_v7 }
 0x610   :  { %v496_v12 = vpack.c.bf16 %v495_v11, %v494_v10 }
 0x612   :  { %680 = vmatmul.mubr.bf16.vlgmr.msra.gmra.mrb[0].mxu1 %v496_v12 }
 0x6e5   :  { %v602_v14 = vpop.f32.mrb[0].mxu1 }
 0x6e6   :  { %v603_v20 = vadd.f32 %v645_v13, %v602_v14  ;;  %v681_v15 = vpop.f32.mrb[1].mxu1 }
 0x6e7   :  { %v605_v16 = vpop.f32.mrb[2].mxu1 }
 0x6e8   :  { %609 = vst [vmem:[#allocation2] sm:$0xff] %v603_v20  ;;  %v606_v27 = vadd.f32 %v645_v13, %v605_v16  ;;  %v682_v19 = vpop.f32.mrb[3].mxu1 }
 0x6ea   :  { %610 = vst [vmem:[#allocation2 + $0x8] sm:$0xff] %v606_v27 }
 0x6eb   :  { %754 = shalt.err (!%p751_p4)
}
 0x6ec   :  { %s755_s10 = scalar_lea.hbm %s1067_s6, 256 }
 0x6ed   :  { %p756_p5 = scmp.ne.s32.totalorder %s1067_s6, %s755_s10  ;;  %p759_p6 = scmp.lt.u32.totalorder %s755_s10, %s1067_s6 }
 0x6ef   :  { %p761_p7 = pnand %p759_p6, %p756_p5 }
 0x6f1   :  { %764 = shalt.err (!%p761_p7)
}
 0x6f2   :  { %s781_s15 = smov 128   ;;  %s782_s16 = smov 8  }
 0x6f3   :  { %622 = dma.vmem_to_hbm [thread:$0]  %s617_s9, 256, %s1067_s6, [#allocation3], %s781_s15, %s781_s15, %s782_s16  }
 0x6f4   :  { %765 = dma.done.wait [#allocation3], 256  }
 0x6f5   :  { %766 = vsyncadd [#allocation3], 4294967040 }
 0x6f6   :  { %626 = vsyncpa [#allocation3], 1 }

// kernel: tpu_custom_call.1
= control target key start
LH: loop header
LB: loop body
LE: loop exit
PB: predicated region body
PF: predicated region fallthrough
CT: control target
= control target key end

     0   :  { %s1061_s0 = inlined_call_operand.vmem [shape: f32[2,8,128], index: 0, kind: input, shape index: {}]   ;;  %s1062_s1 = inlined_call_operand.vmem [shape: f32[1,128], index: 1, kind: input, shape index: {}]   ;;  %s1063_s2 = inlined_call_operand.vmem [shape: f32[1,128], index: 2, kind: input, shape index: {}]   ;;  %s1064_s3 = inlined_call_operand.vmem [shape: bf16[128,160], index: 3, kind: input, shape index: {}]   ;;  %s1065_s4 = inlined_call_operand.vmem [shape: bf16[128,128], index: 4, kind: input, shape index: {}]   ;;  %s1066_s5 = inlined_call_operand.vmem [shape: f32[1,128], index: 5, kind: input, shape index: {}]   ;;  %s1067_s6 = inlined_call_operand.hbm [shape: f32[2,8,128], index: 6, kind: output, shape index: {}]  }
   0x1   :  { %v25_v0 = vld [vmem:[%s1061_s0] sm:$0xff]  ;;  %v26_v1 = vld [vmem:[%s1061_s0 + $0x8] sm:$0xff] }
   0x2   :  { %27 = vadd.xlane.f32.xlu0 %v25_v0 }
   0x6   :  { %29 = vadd.xlane.f32.xlu0 %v26_v1 }
   0x7   :  { %11 = vsyncpa [#allocation3], 0  ;;  %v699_v2 = vld [vmem:[%s1064_s3 + $0x4] ss:$8 sps:$4 sm:$0xff]   ;;  %v701_v3 = vld [vmem:[%s1064_s3] ss:$8 sps:$4 sm:$0xff]  }
   0x8   :  { %v702_v4 = vld [vmem:[%s1064_s3 + $0x14] ss:$8 sps:$4 sm:$0xff]   ;;  %165 = vmatprep.subr.bf16.mxu0 %v699_v2  ;;  %v704_v13 = vld [vmem:[%s1064_s3 + $0x10] ss:$8 sps:$4 sm:$0xff]   ;;  %v705_v14 = vld [vmem:[%s1064_s3 + $0x24] ss:$8 sps:$4 sm:$0xff]  }
   0x9   :  { %166 = vmatpush1.bf16.msra.mxu0 %v701_v3  ;;  %v707_v15 = vld [vmem:[%s1064_s3 + $0x20] ss:$8 sps:$4 sm:$0xff]   ;;  %v708_v16 = vld [vmem:[%s1064_s3 + $0x34] ss:$8 sps:$4 sm:$0xff]   ;;  %v710_v17 = vld [vmem:[%s1064_s3 + $0x30] ss:$8 sps:$4 sm:$0xff]  }
   0xa   :  { %167 = vmatprep.subr.bf16.mxu0 %v702_v4  ;;  %v711_v18 = vld [vmem:[%s1064_s3 + $0x44] ss:$8 sps:$4 sm:$0xff]   ;;  %v713_v19 = vld [vmem:[%s1064_s3 + $0x40] ss:$8 sps:$4 sm:$0xff]   ;;  %v714_v20 = vld [vmem:[%s1064_s3 + $0x54] ss:$8 sps:$4 sm:$0xff]  }
   0xb   :  { %v767_v21 = vmov 0   ;;  %v716_v22 = vld [vmem:[%s1064_s3 + $0x50] ss:$8 sps:$4 sm:$0xff]   ;;  %v717_v23 = vld [vmem:[%s1064_s3 + $0x64] ss:$8 sps:$4 sm:$0xff]   ;;  %vm211_vm0 = vcmask 1041409  }
   0xc   :  { %197 = vmatprep.mubr.bf16.mxu0 %v767_v21  ;;  %v719_v24 = vld [vmem:[%s1064_s3 + $0x60] ss:$8 sps:$4 sm:$0xff]   ;;  %v720_v25 = vld [vmem:[%s1064_s3 + $0x74] ss:$8 sps:$4 sm:$0xff]   ;;  %v722_v26 = vld [vmem:[%s1064_s3 + $0x70] ss:$8 sps:$4 sm:$0xff]  }
   0xd   :  { %168 = vmatpush1.bf16.msra.mxu0 %v704_v13  ;;  %v627_v35 = vld [vmem:[%s1062_s1] ss:$0 sm:$0xff]  ;;  %s768_s1 = smov 16   ;;  %s770_s10 = smov 80   ;;  %vm255_vm1 = vcmask 130048   ;;  %vm257_vm2 = vcmask 261120  }
   0xe   :  { %169 = vmatprep.subr.bf16.mxu0 %v705_v14  ;;  %v628_v39 = vld [vmem:[%s1063_s2] ss:$0 sm:$0xff]  ;;  %s769_s2 = smov 32   ;;  %s771_s11 = smov 48   ;;  %vm259_vm3 = vcmask 392192   ;;  %vm261_vm4 = vcmask 523264  }
   0xf   :  { %s772_s12 = smov 112   ;;  %s773_s13 = smov 64   ;;  %vm263_vm5 = vcmask 654336   ;;  %vm265_vm6 = vcmask 785408   ;;  %vm267_vm7 = vcmask 916480   ;;  %vm779_vm11 = vmmov 0  }
  0x10   :  { %s774_s14 = smov 96   ;;  %s776_s15 = smov 127  }
  0x11   :  { %170 = vmatpush1.bf16.msra.mxu0 %v707_v15  ;;  %s777_s16 = smov 1   ;;  %s780_s3 = smov [#allocation2]  }
  0x12   :  { %171 = vmatprep.subr.bf16.mxu0 %v708_v16  ;;  %s616_s9 = sshll.u32 %s780_s3, 4  ;;  %s617_s9 = int_to_ptr.vmem [resolvable:$true] %s616_s9 }
  0x13   :  { %p748_p1 = scmp.lt.s32.totalorder %s617_s9, %s617_s9 }
  0x15   :  { %172 = vmatpush1.bf16.msra.mxu0 %v710_v17 }
  0x16   :  { %173 = vmatprep.subr.bf16.mxu0 %v711_v18 }
  0x19   :  { %174 = vmatpush1.bf16.msra.mxu0 %v713_v19 }
  0x1a   :  { %175 = vmatprep.subr.bf16.mxu0 %v714_v20 }
  0x1d   :  { %176 = vmatpush1.bf16.msra.mxu0 %v716_v22 }
  0x1e   :  { %177 = vmatprep.subr.bf16.mxu0 %v717_v23 }
  0x21   :  { %178 = vmatpush1.bf16.msra.mxu0 %v719_v24 }
  0x22   :  { %179 = vmatprep.subr.bf16.mxu0 %v720_v25 }
  0x25   :  { %180 = vmatpush1.bf16.msra.mxu0 %v722_v26 }
  0x8f   :  { %v28_v5 = vpop.xlane.xlu0 %27 }
  0x90   :  { %v32_v6 = vmul.f32 0.0078125, %v28_v5 }
  0x92   :  { %v34_v7 = vsub.f32 %v25_v0, %v32_v6 }
  0x93   :  { %v30_v8 = vpop.xlane.xlu0 %29 }
  0x94   :  { %v33_v9 = vmul.f32 0.0078125, %v30_v8  ;;  %v36_v10 = vmul.f32 %v34_v7, %v34_v7  ;;  %v775_v8 = vmov 1966171168  }
  0x96   :  { %v35_v11 = vsub.f32 %v26_v1, %v33_v9  ;;  %38 = vadd.xlane.f32.xlu1 %v36_v10  ;;  %v271_v9 = vunpack.c.l.s4 %v775_v8  ;;  %v273_v10 = vlaneseq }
  0x98   :  { %v37_v12 = vmul.f32 %v35_v11, %v35_v11  ;;  %v272_v15 = vunpack.c.0.s8 %v271_v9  ;;  %v274_v16 = vshrl.u32 %v273_v10, 7 }
  0x9a   :  { %40 = vadd.xlane.f32.xlu1 %v37_v12  ;;  %v925_v20 = vsub.s32 %v272_v15, %v274_v16 }
 0x123   :  { %v39_v27 = vpop.xlane.xlu1 %38 }
 0x124   :  { %v42_v28 = vmul.f32 0.0078125, %v39_v27  ;;  %v931_v27 = vsub.s32 0, %v274_v16 }
 0x126   :  { %v44_v29 = vadd.f32 1e-05, %v42_v28 }
 0x127   :  { %v41_v30 = vpop.xlane.xlu1 %40 }
 0x128   :  { %731 = vrsqrt.f32 %v44_v29  ;;  %v43_v31 = vmul.f32 0.0078125, %v41_v30 }
 0x12a   :  { %v45_v32 = vadd.f32 1e-05, %v43_v31 }
 0x12c   :  { %733 = vrsqrt.f32 %v45_v32 }
 0x132   :  { %v732_v33 = vpop.eup %731 }
 0x133   :  { %v48_v34 = vmul.f32 %v732_v33, %v34_v7 }
 0x135   :  { %v57_v38 = vmul.f32 %v627_v35, %v48_v34 }
 0x136   :  { %v734_v36 = vpop.eup %733 }
 0x137   :  { %v49_v37 = vmul.f32 %v734_v36, %v35_v11  ;;  %v66_v41 = vadd.f32 %v628_v39, %v57_v38 }
 0x139   :  { %v58_v40 = vmul.f32 %v627_v35, %v49_v37  ;;  %v365_v35 = vand.u32 127, %v273_v10 }
 0x13b   :  { %v67_v42 = vadd.f32 %v628_v39, %v58_v40  ;;  %v382_v36 = vand.u32 1, %v365_v35 }
 0x13d   :  { %v68_v43 = vpack.c.bf16 %v67_v42, %v66_v41  ;;  %vm383_vm8 = vcmp.eq.s32.totalorder %v382_v36, 0 }
 0x13f   :  { %198 = vmatmul.mubr.bf16.vlgmr.msra.gmra.mrb[0].mxu0 %v68_v43 }
 0x212   :  { %v878_v44 = vpop.f32.mrb[0].mxu0 }
 0x213   :  { %v201_v45 = vpop.f32.mrb[1].mxu0 }
 0x214   :  { %v880_v46 = vpop.f32.mrb[2].mxu0  ;;  %v214_v47 = vrot.slane %v201_v45, 1  ;;  %v219_v48 = vrot.slane %v201_v45, 2  ;;  %v237_v49 = vrot.slane %v201_v45, 5  ;;  %v225_v51 = vrot.slane %v201_v45, 3 }
 0x215   :  { %v205_v50 = vpop.f32.mrb[3].mxu0  ;;  %v249_v52 = vrot.slane %v201_v45, 7  ;;  %v231_v53 = vrot.slane %v201_v45, 4  ;;  %v243_v54 = vrot.slane %v201_v45, 6 }
 0x216   :  { %v883_v55 = vsel %vm211_vm0, %v205_v50, %v214_v47  ;;  %v220_v56 = vrot.slane %v205_v50, 1  ;;  %v238_v57 = vrot.slane %v205_v50, 4  ;;  %v226_v58 = vrot.slane %v205_v50, 2 }
 0x217   :  { %216 = vrot.lane.b32.xlu0 %v883_v55, %s768_s1  ;;  %v250_v59 = vrot.slane %v205_v50, 6  ;;  %v232_v60 = vrot.slane %v205_v50, 3  ;;  %v244_v61 = vrot.slane %v205_v50, 5  ;;  %v210_v62 = vrot.slane %v205_v50, 7 }
 0x218   :  { %v888_v63 = vsel %vm211_vm0, %v220_v56, %v219_v48  ;;  %v891_v0 = vsel %vm211_vm0, %v238_v57, %v237_v49  ;;  %v894_v1 = vsel %vm211_vm0, %v226_v58, %v225_v51  ;;  %v422_v56 = vand.u32 32, %v365_v35 }
 0x219   :  { %222 = vrot.lane.b32.xlu1 %v888_v63, %s769_s2  ;;  %v899_v2 = vsel %vm211_vm0, %v250_v59, %v249_v52  ;;  %v902_v3 = vsel %vm211_vm0, %v232_v60, %v231_v53  ;;  %v905_v4 = vsel %vm211_vm0, %v244_v61, %v243_v54  ;;  %v908_v5 = vsel %vm211_vm0, %v210_v62, %v201_v45 }
 0x21a   :  { %v402_v45 = vand.u32 16, %v365_v35  ;;  %vm955_vm10 = vcmp.eq.s32.totalorder %v422_v56, 0 }
 0x21b   :  { %240 = vrot.lane.b32.xlu0 %v891_v0, %s770_s10 }
 0x21c   :  { %vm943_vm9 = vcmp.eq.s32.totalorder %v402_v45, 0 }
 0x21d   :  { %228 = vrot.lane.b32.xlu1 %v894_v1, %s771_s11 }
 0x21f   :  { %252 = vrot.lane.b32.xlu0 %v899_v2, %s772_s12 }
 0x221   :  { %234 = vrot.lane.b32.xlu1 %v902_v3, %s773_s13 }
 0x225   :  { %246 = vrot.lane.b32.xlu1 %v905_v4, %s774_s14 }
 0x289   :  { %v217_v7 = vpop.permute.xlu0 %216 }
 0x28a   :  { %v256_v11 = vsel %vm255_vm1, %v908_v5, %v217_v7 }
 0x28b   :  { %v223_v6 = vpop.permute.xlu1 %222 }
 0x28c   :  { %v258_v13 = vsel %vm257_vm2, %v256_v11, %v223_v6 }
 0x28d   :  { %v241_v14 = vpop.permute.xlu0 %240 }
 0x28f   :  { %v229_v12 = vpop.permute.xlu1 %228 }
 0x290   :  { %v260_v17 = vsel %vm259_vm3, %v258_v13, %v229_v12 }
 0x291   :  { %v253_v23 = vpop.permute.xlu0 %252 }
 0x293   :  { %v235_v18 = vpop.permute.xlu1 %234 }
 0x294   :  { %v262_v19 = vsel %vm261_vm4, %v260_v17, %v235_v18 }
 0x295   :  { %v264_v22 = vsel %vm263_vm5, %v262_v19, %v241_v14 }
 0x297   :  { %v247_v21 = vpop.permute.xlu1 %246 }
 0x298   :  { %v266_v24 = vsel %vm265_vm6, %v264_v22, %v247_v21 }
 0x299   :  { %v268_v25 = vsel %vm267_vm7, %v266_v24, %v253_v23 }
 0x29a   :  { %v276_v26 = vrot.slane %v268_v25, %v925_v20 }
 0x29c   :  { %v277_v28 = vcombine.high %v276_v26, %v276_v26  ;;  %v284_v29 = vrot.slane %v276_v26, %v925_v20 }
 0x29e   :  { %v295_v30 = vrot.slane %v284_v29, %v931_v27  ;;  %v291_v31 = vrot.slane %v277_v28, %v925_v20  ;;  %v723_v29 = vld [vmem:[%s1065_s4] sm:$0xff]  }
 0x2a0   :  { %v366_v32 = vmul.f32 %v295_v30, %v878_v44  ;;  %v299_v33 = vrot.slane %v291_v31, %v931_v27  ;;  %v778_v30 = vmov 0.0   ;;  %v724_v31 = vld [vmem:[%s1065_s4 + $0x8] sm:$0xff]  }
 0x2a1   :  { %663 = vmatprep.subr.bf16.mxu1 %v778_v30  ;;  %679 = vmatprep.mubr.msk.bf16.mxu1 %vm779_vm11, %v778_v30 }
 0x2a2   :  { %370 = vrot.lane.b32.xlu1 %v366_v32, %s776_s15  ;;  %v367_v34 = vmul.f32 %v299_v33, %v880_v46  ;;  %664 = vmatpush3.bf16.msra.mxu1 %v723_v29  ;;  %v726_v33 = vld [vmem:[%s1065_s4 + $0x18] sm:$0xff]  }
 0x2a3   :  { %665 = vmatprep.subr.bf16.mxu1 %v778_v30 }
 0x2a4   :  { %372 = vrot.lane.b32.xlu0 %v367_v34, %s776_s15 }
 0x2a6   :  { %376 = vrot.lane.b32.xlu1 %v366_v32, %s777_s16  ;;  %666 = vmatpush3.bf16.msra.mxu1 %v724_v31 }
 0x2a7   :  { %667 = vmatprep.subr.bf16.mxu1 %v778_v30 }
 0x2a8   :  { %378 = vrot.lane.b32.xlu0 %v367_v34, %s777_s16 }
 0x314   :  { %v371_v37 = vpop.permute.xlu1 %370 }
 0x316   :  { %v373_v38 = vpop.permute.xlu0 %372 }
 0x318   :  { %v377_v39 = vpop.permute.xlu1 %376 }
 0x319   :  { %v384_v40 = vsel %vm383_vm8, %v371_v37, %v377_v39 }
 0x31a   :  { %v386_v41 = vadd.f32 %v384_v40, %v366_v32  ;;  %v379_v42 = vpop.permute.xlu0 %378  ;;  %v725_v32 = vld [vmem:[%s1065_s4 + $0x10] sm:$0xff]  }
 0x31b   :  { %v385_v43 = vsel %vm383_vm8, %v373_v38, %v379_v42  ;;  %668 = vmatpush3.bf16.msra.mxu1 %v725_v32  ;;  %v728_v38 = vld [vmem:[%s1065_s4 + $0x28] sm:$0xff]   ;;  %v730_v42 = vld [vmem:[%s1065_s4 + $0x38] sm:$0xff]  }
 0x31c   :  { %v387_v44 = vadd.f32 %v385_v43, %v367_v34  ;;  %390 = vrot.lane.b32.xlu1 %v386_v41, %s772_s12  ;;  %669 = vmatprep.subr.bf16.mxu1 %v778_v30 }
 0x31e   :  { %392 = vrot.lane.b32.xlu0 %v387_v44, %s772_s12 }
 0x31f   :  { %670 = vmatpush3.bf16.msra.mxu1 %v726_v33 }
 0x320   :  { %396 = vrot.lane.b32.xlu1 %v386_v41, %s768_s1  ;;  %671 = vmatprep.subr.bf16.mxu1 %v778_v30 }
 0x322   :  { %398 = vrot.lane.b32.xlu0 %v387_v44, %s768_s1 }
 0x38e   :  { %v391_v46 = vpop.permute.xlu1 %390 }
 0x390   :  { %v393_v47 = vpop.permute.xlu0 %392 }
 0x392   :  { %v397_v49 = vpop.permute.xlu1 %396 }
 0x393   :  { %v404_v50 = vsel %vm943_vm9, %v391_v46, %v397_v49 }
 0x394   :  { %v406_v51 = vmax.f32 %v386_v41, %v404_v50  ;;  %v399_v52 = vpop.permute.xlu0 %398 }
 0x395   :  { %v405_v53 = vsel %vm943_vm9, %v393_v47, %v399_v52 }
 0x396   :  { %v407_v54 = vmax.f32 %v387_v44, %v405_v53  ;;  %410 = vrot.lane.b32.xlu1 %v406_v51, %s774_s14 }
 0x398   :  { %412 = vrot.lane.b32.xlu0 %v407_v54, %s774_s14 }
 0x39a   :  { %416 = vrot.lane.b32.xlu1 %v406_v51, %s769_s2 }
 0x39c   :  { %418 = vrot.lane.b32.xlu0 %v407_v54, %s769_s2 }
 0x408   :  { %v411_v57 = vpop.permute.xlu1 %410 }
 0x40a   :  { %v413_v58 = vpop.permute.xlu0 %412 }
 0x40c   :  { %v417_v60 = vpop.permute.xlu1 %416 }
 0x40d   :  { %v424_v61 = vsel %vm955_vm10, %v411_v57, %v417_v60 }
 0x40e   :  { %v426_v62 = vmax.f32 %v406_v51, %v424_v61  ;;  %v419_v6 = vpop.permute.xlu0 %418 }
 0x40f   :  { %v425_v7 = vsel %vm955_vm10, %v413_v58, %v419_v6 }
 0x410   :  { %v427_v8 = vmax.f32 %v407_v54, %v425_v7  ;;  %430 = vrot.lane.b32.xlu1 %v426_v62, %s773_s13 }
 0x412   :  { %432 = vrot.lane.b32.xlu0 %v427_v8, %s773_s13 }
 0x482   :  { %v431_v9 = vpop.permute.xlu1 %430 }
 0x483   :  { %v436_v10 = vmax.f32 %v426_v62, %v431_v9 }
 0x484   :  { %v433_v11 = vpop.permute.xlu0 %432 }
 0x485   :  { %v438_v12 = vsub.f32 %v386_v41, %v436_v10  ;;  %v437_v13 = vmax.f32 %v427_v8, %v433_v11  ;;  %v729_v41 = vld [vmem:[%s1065_s4 + $0x30] sm:$0xff]  }
 0x487   :  { %v440_v14 = vmul.f32 1.442695, %v438_v12  ;;  %v439_v15 = vsub.f32 %v387_v44, %v437_v13  ;;  %v645_v13 = vld [vmem:[%s1066_s5] ss:$0 sm:$0xff] }
 0x489   :  { %735 = vpow2.f32 %v440_v14  ;;  %v442_v16 = vmul.f32 1.442695, %v439_v15 }
 0x48b   :  { %737 = vpow2.f32 %v442_v16 }
 0x493   :  { %v965_v17 = vpop.eup %735 }
 0x494   :  { %446 = vrot.lane.b32.xlu1 %v965_v17, %s772_s12 }
 0x495   :  { %v969_v18 = vpop.eup %737 }
 0x496   :  { %448 = vrot.lane.b32.xlu0 %v969_v18, %s772_s12 }
 0x498   :  { %452 = vrot.lane.b32.xlu1 %v965_v17, %s768_s1 }
 0x49a   :  { %454 = vrot.lane.b32.xlu0 %v969_v18, %s768_s1 }
 0x506   :  { %v447_v19 = vpop.permute.xlu1 %446 }
 0x508   :  { %v449_v21 = vpop.permute.xlu0 %448 }
 0x50a   :  { %v453_v22 = vpop.permute.xlu1 %452 }
 0x50b   :  { %v458_v23 = vsel %vm943_vm9, %v447_v19, %v453_v22 }
 0x50c   :  { %v460_v24 = vadd.f32 %v965_v17, %v458_v23  ;;  %v455_v25 = vpop.permute.xlu0 %454 }
 0x50d   :  { %v459_v26 = vsel %vm943_vm9, %v449_v21, %v455_v25 }
 0x50e   :  { %v461_v28 = vadd.f32 %v969_v18, %v459_v26  ;;  %464 = vrot.lane.b32.xlu1 %v460_v24, %s774_s14 }
 0x510   :  { %466 = vrot.lane.b32.xlu0 %v461_v28, %s774_s14 }
 0x512   :  { %470 = vrot.lane.b32.xlu1 %v460_v24, %s769_s2 }
 0x514   :  { %472 = vrot.lane.b32.xlu0 %v461_v28, %s769_s2 }
 0x516   :  { %302 = vrot.lane.b32.xlu1 %v908_v5, %s772_s12 }
 0x518   :  { %306 = vrot.lane.b32.xlu0 %v888_v63, %s768_s1  ;;  %v727_v63 = vld [vmem:[%s1065_s4 + $0x20] sm:$0xff]   ;;  %s743_s1 = scalar_lea.vmem %s617_s9, 256 }
 0x519   :  { %672 = vmatpush3.bf16.msra.mxu1 %v727_v63  ;;  %p744_p0 = scmp.ne.s32.totalorder %s617_s9, %s743_s1  ;;  %p749_p2 = scmp.lt.s32.totalorder %s743_s1, %s743_s1 }
 0x51a   :  { %309 = vrot.lane.b32.xlu1 %v894_v1, %s769_s2  ;;  %673 = vmatprep.subr.bf16.mxu1 %v778_v30 }
 0x51b   :  { %p750_p3 = por %p749_p2, %p748_p1 }
 0x51d   :  { %674 = vmatpush3.bf16.msra.mxu1 %v728_v38  ;;  %p751_p4 = pnand %p750_p3, %p744_p0 }
 0x51e   :  { %675 = vmatprep.subr.bf16.mxu1 %v778_v30 }
 0x521   :  { %676 = vmatpush3.bf16.msra.mxu1 %v729_v41 }
 0x522   :  { %677 = vmatprep.subr.bf16.mxu1 %v778_v30 }
 0x525   :  { %678 = vmatpush3.bf16.msra.mxu1 %v730_v42 }
 0x580   :  { %v465_v34 = vpop.permute.xlu1 %464 }
 0x582   :  { %v467_v5 = vpop.permute.xlu0 %466 }
 0x584   :  { %v471_v35 = vpop.permute.xlu1 %470 }
 0x585   :  { %v476_v1 = vsel %vm955_vm10, %v465_v34, %v471_v35 }
 0x586   :  { %v478_v36 = vadd.f32 %v476_v1, %v460_v24  ;;  %v473_v37 = vpop.permute.xlu0 %472 }
 0x587   :  { %v477_v39 = vsel %vm955_vm10, %v467_v5, %v473_v37 }
 0x588   :  { %v479_v40 = vadd.f32 %v477_v39, %v461_v28  ;;  %482 = vrot.lane.b32.xlu0 %v478_v36, %s773_s13  ;;  %v303_v43 = vpop.permute.xlu1 %302 }
 0x58a   :  { %484 = vrot.lane.b32.xlu1 %v479_v40, %s773_s13  ;;  %v307_v44 = vpop.permute.xlu0 %306 }
 0x58c   :  { %312 = vrot.lane.b32.xlu0 %v902_v3, %s771_s11  ;;  %v324_v3 = vsel %vm255_vm1, %v303_v43, %v883_v55  ;;  %v310_v45 = vpop.permute.xlu1 %309 }
 0x58d   :  { %v325_v47 = vsel %vm257_vm2, %v324_v3, %v307_v44 }
 0x58e   :  { %315 = vrot.lane.b32.xlu1 %v891_v0, %s773_s13  ;;  %v326_v0 = vsel %vm259_vm3, %v325_v47, %v310_v45 }
 0x590   :  { %318 = vrot.lane.b32.xlu0 %v905_v4, %s770_s10 }
 0x592   :  { %321 = vrot.lane.b32.xlu1 %v899_v2, %s774_s14 }
 0x5fa   :  { %v483_v46 = vpop.permute.xlu0 %482 }
 0x5fb   :  { %v488_v48 = vadd.f32 %v483_v46, %v478_v36 }
 0x5fc   :  { %v485_v49 = vpop.permute.xlu1 %484 }
 0x5fd   :  { %v489_v50 = vadd.f32 %v485_v49, %v479_v40  ;;  %739 = vrcp.f32 %v488_v48 }
 0x5fe   :  { %v313_v4 = vpop.permute.xlu0 %312 }
 0x5ff   :  { %741 = vrcp.f32 %v489_v50  ;;  %v327_v51 = vsel %vm261_vm4, %v326_v0, %v313_v4 }
 0x600   :  { %v316_v2 = vpop.permute.xlu1 %315 }
 0x601   :  { %v328_v52 = vsel %vm263_vm5, %v327_v51, %v316_v2 }
 0x602   :  { %v319_v53 = vpop.permute.xlu0 %318 }
 0x603   :  { %v329_v55 = vsel %vm265_vm6, %v328_v52, %v319_v53 }
 0x604   :  { %v322_v54 = vpop.permute.xlu1 %321 }
 0x605   :  { %v330_v56 = vsel %vm267_vm7, %v329_v55, %v322_v54 }
 0x606   :  { %v338_v57 = vrot.slane %v330_v56, %v925_v20 }
 0x607   :  { %v740_v58 = vpop.eup %739 }
 0x608   :  { %v339_v59 = vcombine.high %v338_v57, %v338_v57  ;;  %v346_v60 = vrot.slane %v338_v57, %v925_v20  ;;  %v492_v8 = vmul.f32 %v740_v58, %v965_v17 }
 0x609   :  { %v742_v61 = vpop.eup %741 }
 0x60a   :  { %v353_v62 = vrot.slane %v339_v59, %v925_v20  ;;  %v357_v6 = vrot.slane %v346_v60, %v931_v27  ;;  %v493_v9 = vmul.f32 %v742_v61, %v969_v18 }
 0x60c   :  { %v361_v7 = vrot.slane %v353_v62, %v931_v27  ;;  %v494_v10 = vmul.f32 %v492_v8, %v357_v6 }
 0x60e   :  { %v495_v11 = vmul.f32 %v493_v9, %v361_v7 }
 0x610   :  { %v496_v12 = vpack.c.bf16 %v495_v11, %v494_v10 }
 0x612   :  { %680 = vmatmul.mubr.bf16.vlgmr.msra.gmra.mrb[0].mxu1 %v496_v12 }
 0x6e5   :  { %v602_v14 = vpop.f32.mrb[0].mxu1 }
 0x6e6   :  { %v603_v20 = vadd.f32 %v645_v13, %v602_v14  ;;  %v681_v15 = vpop.f32.mrb[1].mxu1 }
 0x6e7   :  { %v605_v16 = vpop.f32.mrb[2].mxu1 }
 0x6e8   :  { %609 = vst [vmem:[#allocation2] sm:$0xff] %v603_v20  ;;  %v606_v27 = vadd.f32 %v645_v13, %v605_v16  ;;  %v682_v19 = vpop.f32.mrb[3].mxu1 }
 0x6ea   :  { %610 = vst [vmem:[#allocation2 + $0x8] sm:$0xff] %v606_v27 }
 0x6eb   :  { %754 = shalt.err (!%p751_p4)
}
 0x6ec   :  { %s755_s10 = scalar_lea.hbm %s1067_s6, 256 }
 0x6ed   :  { %p756_p5 = scmp.ne.s32.totalorder %s1067_s6, %s755_s10  ;;  %p759_p6 = scmp.lt.u32.totalorder %s755_s10, %s1067_s6 }
 0x6ef   :  { %p761_p7 = pnand %p759_p6, %p756_p5 }
 0x6f1   :  { %764 = shalt.err (!%p761_p7)
}
 0x6f2   :  { %s781_s15 = smov 128   ;;  %s782_s16 = smov 8  }
 0x6f3   :  { %622 = dma.vmem_to_hbm [thread:$0]  %s617_s9, 256, %s1067_s6, [#allocation3], %s781_s15, %s781_s15, %s782_s16  }
 0x6f4   :  { %765 = dma.done.wait [#allocation3], 256  }
 0x6f5   :  { %766 = vsyncadd [#allocation3], 4294967040 }
 0x6f6   :  { %626 = vsyncpa [#allocation3], 1 }

</bundles_post_ra>
